<compile_context>
chip_gen: v7x
topology: tpu7x:2x2x1
jax: 0.10.0
libtpu: 0.0.40
codegen_flags: <defaults>
</compile_context>

<pallas_src>
import jax
import jax.numpy as jnp
from jax import lax
from jax.experimental import pallas as pl
from jax.experimental.pallas import tpu as pltpu  # noqa: F401

# ----------------------------- config --------------------------------------
B = 2
CHANNELS = 3
IMAGE = 16
PATCH = 4
GRID_HW = IMAGE // PATCH
NPATCH = GRID_HW * GRID_HW          # 16 patches (seq len per image)
CPP = CHANNELS * PATCH * PATCH      # 48 flattened patch features
CPP_PAD = 128                       # lane-aligned (zero-padded) patch dim

HIDDEN = 128
HEADS = 4
HEAD_DIM = HIDDEN // HEADS          # 32
INTER = 256
LAYERS = 2
EPS = 1e-6
BN = B * NPATCH                     # 32 = batch folded into M
SCOLS = HEADS * BN                  # 128 = lane-batched score columns
# NOTE: BN == HEAD_DIM == 32 here, so one (128,128) block-diagonal mask
# serves the K/V construction AND the segmented softmax denominator.


# ------------------------- in-kernel helpers --------------------------------
def _layernorm(x, g, b, eps):
    mu = jnp.mean(x, axis=-1, keepdims=True)
    xc = x - mu
    var = jnp.mean(xc * xc, axis=-1, keepdims=True)
    return xc * lax.rsqrt(var + eps) * g + b


def _gelu_tanh(x):
    # matches torch.nn.functional.gelu(approximate='tanh')
    c = 0.7978845608028654  # sqrt(2/pi)
    return 0.5 * x * (1.0 + jnp.tanh(c * (x + 0.044715 * x * x * x)))


# ------------------------------ kernel --------------------------------------
def siglip_fused_kernel(patches_ref, pw_ref, pb_ref, pos_ref,
                        bias_ref, hmask_ref,
                        ln1g_ref, ln1b_ref, wqkv_ref, bqkv_ref,
                        wo_ref, bo_ref, ln2g_ref, ln2b_ref,
                        w1_ref, b1_ref, w2_ref, b2_ref,
                        postg_ref, postb_ref, out_ref):
    f32 = jnp.float32
    bf16 = jnp.bfloat16

    # Precomputed masks (hoisted once, reused by every layer).
    attn_bias = bias_ref[...]                       # (BN, SCOLS) f32: 0 / -1e30
    hmask_f = hmask_ref[...]                        # (128, 128) f32 0/1 block-diag
    hmask16 = hmask_f.astype(bf16)

    # ---- patch embedding (strided conv as matmul) + position embedding ----
    h = (jnp.dot(patches_ref[...].astype(bf16), pw_ref[...],
                 preferred_element_type=f32)
         + pb_ref[...] + pos_ref[...])                              # (BN, D) f32

    for l in range(LAYERS):                                          # static unroll
        # ---- LayerNorm1 + fused QKV projection (scale folded into Wq) ----
        x = _layernorm(h, ln1g_ref[l], ln1b_ref[l], EPS)
        qkv = (jnp.dot(x.astype(bf16), wqkv_ref[l],
                       preferred_element_type=f32) + bqkv_ref[l])    # (BN, 3D)

        # 128-lane-aligned slices only (no 32-offset lane extracts).
        q16 = qkv[:, :HIDDEN].astype(bf16)                           # (BN, D)
        k16 = qkv[:, HIDDEN:2 * HIDDEN].astype(bf16)
        v16 = qkv[:, 2 * HIDDEN:].astype(bf16)

        # Block-diagonal operands: rows g*BN+j of K_blk/V_blk hold k/v row j,
        # zeroed outside head-block g (build = sublane tile + 0/1 mask mul).
        k_blk = jnp.concatenate([k16] * HEADS, axis=0) * hmask16     # (SCOLS, D)
        v_blk = jnp.concatenate([v16] * HEADS, axis=0) * hmask16     # (SCOLS, D)

        # Scores for all heads in one full-width matmul:
        #   s[i, g*BN + j] = q_g[i, :] . k_g[j, :]   (scale folded into Wq)
        s = lax.dot_general(q16, k_blk, (((1,), (1,)), ((), ())),
                            preferred_element_type=f32)              # (BN, SCOLS)
        s = s + attn_bias                                            # per-image mask
        s = s - jnp.max(s, axis=-1, keepdims=True)                   # global row max ok
        p = jnp.exp(s)                                               # f32 softmax numerator
        # Segmented per-head denominator via one MXU matmul with the 0/1 mask
        # (exact in f32; result is already broadcast back to every column).
        denom = jnp.dot(p, hmask_f, preferred_element_type=f32)      # (BN, SCOLS)
        p16 = (p * pl.reciprocal(denom, approx=True)).astype(bf16)

        # P @ V for all heads at once; columns land in the concatenated
        # (head-major) layout, so the out-projection is one plain matmul.
        ctx = jnp.dot(p16, v_blk, preferred_element_type=f32)        # (BN, D)
        attn = (jnp.dot(ctx.astype(bf16), wo_ref[l],
                        preferred_element_type=f32) + bo_ref[l])
        # attention_dropout p = 0.0 (eval) -> no-op
        h = h + attn                                                  # residual 1

        # ---- LayerNorm2 + MLP ----
        y = _layernorm(h, ln2g_ref[l], ln2b_ref[l], EPS)
        y = jnp.dot(y.astype(bf16), w1_ref[l],
                    preferred_element_type=f32) + b1_ref[l]
        y = _gelu_tanh(y)
        y = jnp.dot(y.astype(bf16), w2_ref[l],
                    preferred_element_type=f32) + b2_ref[l]
        h = h + y                                                     # residual 2

    # ---- post LayerNorm ----
    out_ref[...] = _layernorm(h, postg_ref[...], postb_ref[...], EPS)


# --------------------------- pallas wrapper ---------------------------------
def _patchify(pixel_values):
    # NCHW -> (B*NPATCH, CPP): patch order gi*grid_w + gj, features ordered
    # (c, ph, pw) — matches Conv2d(stride=patch) + flatten(2).transpose(1,2).
    x = pixel_values.reshape(B, CHANNELS, GRID_HW, PATCH, GRID_HW, PATCH)
    x = x.transpose(0, 2, 4, 1, 3, 5).reshape(BN, CPP)
    return jnp.pad(x, ((0, 0), (0, CPP_PAD - CPP)))     # zero-pad to 128 lanes


@jax.jit
def siglip_vision_transformer(pixel_values, params):
    patches = _patchify(pixel_values)
    pos = jnp.tile(params["pos_emb"], (B, 1))           # (BN, D): pos per row
    out = pl.pallas_call(
        siglip_fused_kernel,
        out_shape=jax.ShapeDtypeStruct((BN, HIDDEN), jnp.float32),
    )(patches, params["patch_w"], params["patch_b"], pos,
      params["attn_bias"], params["head_mask"],
      params["ln1_g"], params["ln1_b"], params["wqkv"], params["bqkv"],
      params["wo"], params["bo"], params["ln2_g"], params["ln2_b"],
      params["w1"], params["b1"], params["w2"], params["b2"],
      params["post_g"], params["post_b"])
    return out.reshape(B, NPATCH, HIDDEN)


# ------------------------------- params -------------------------------------
def init_params(key):
    scale = HEAD_DIM ** (-0.5)
    f32, bf16 = jnp.float32, jnp.bfloat16

    def nrm(k, shape, std=0.02):
        return jax.random.normal(k, shape, f32) * std

    keys = jax.random.split(key, 3 + LAYERS)
    patch_w = nrm(keys[0], (CPP, HIDDEN))
    params = {
        # Conv2d(C, D, k=P, stride=P) weight realized as a (C*P*P, D) matmul
        # weight, zero-padded to 128 input lanes (padding preserves results
        # since the padded input features are zero).  Stored bf16.
        "patch_w": jnp.pad(patch_w, ((0, CPP_PAD - CPP), (0, 0))).astype(bf16),
        "patch_b": nrm(keys[1], (1, HIDDEN)),
        "pos_emb": nrm(keys[2], (NPATCH, HIDDEN)),
        "post_g": jnp.ones((1, HIDDEN), f32),
        "post_b": jnp.zeros((1, HIDDEN), f32),
    }

    # Precomputed masks (review item: no iota / int-divide in kernel).
    rows = jnp.arange(BN) // NPATCH                      # image id of query row
    cols = (jnp.arange(SCOLS) % BN) // NPATCH            # image id of key column
    params["attn_bias"] = jnp.where(rows[:, None] == cols[None, :],
                                    0.0, -1e30).astype(f32)          # (BN, SCOLS)
    blk_r = jnp.arange(SCOLS) // BN
    blk_c = jnp.arange(HIDDEN) // HEAD_DIM
    params["head_mask"] = (blk_r[:, None] == blk_c[None, :]).astype(f32)  # (128,128)

    ln1_g, ln1_b, wqkv, bqkv, wo, bo = [], [], [], [], [], []
    ln2_g, ln2_b, w1, b1, w2, b2 = [], [], [], [], [], []
    for l in range(LAYERS):
        lk = jax.random.split(keys[3 + l], 8)
        wq, bq = nrm(lk[0], (HIDDEN, HIDDEN)), nrm(lk[1], (1, HIDDEN))
        wk, bk = nrm(lk[2], (HIDDEN, HIDDEN)), jnp.zeros((1, HIDDEN), f32)
        wv, bv = nrm(lk[3], (HIDDEN, HIDDEN)), jnp.zeros((1, HIDDEN), f32)
        # nn.Linear weights stored pre-transposed (in, out).  The attention
        # scale head_dim**-0.5 is folded into Wq/bq (equivalent to scaling
        # the scores).  Matmul weights stored bf16, biases/LN params f32.
        wqkv.append(jnp.concatenate([wq * scale, wk, wv], axis=1).astype(bf16))
        bqkv.append(jnp.concatenate([bq * scale, bk, bv], axis=1))   # (1, 3D) f32
        ln1_g.append(jnp.ones((1, HIDDEN), f32))
        ln1_b.append(jnp.zeros((1, HIDDEN), f32))
        wo.append(nrm(lk[4], (HIDDEN, HIDDEN)).astype(bf16))
        bo.append(jnp.zeros((1, HIDDEN), f32))
        ln2_g.append(jnp.ones((1, HIDDEN), f32))
        ln2_b.append(jnp.zeros((1, HIDDEN), f32))
        w1.append(nrm(lk[5], (HIDDEN, INTER)).astype(bf16))
        b1.append(nrm(lk[6], (1, INTER)))
        w2.append(nrm(lk[7], (INTER, HIDDEN)).astype(bf16))
        b2.append(jnp.zeros((1, HIDDEN), f32))

    stack = lambda xs: jnp.stack(xs, axis=0)             # leading LAYERS axis
    params.update({
        "ln1_g": stack(ln1_g), "ln1_b": stack(ln1_b),
        "wqkv": stack(wqkv), "bqkv": stack(bqkv),
        "wo": stack(wo), "bo": stack(bo),
        "ln2_g": stack(ln2_g), "ln2_b": stack(ln2_b),
        "w1": stack(w1), "b1": stack(b1),
        "w2": stack(w2), "b2": stack(b2),
    })
    return params


# --------------------- pure-JAX reference (f32 math) -------------------------
def _reference_forward(pixel_values, params):
    f32 = jnp.float32

    def ln(x, g, b):
        mu = x.mean(-1, keepdims=True)
        var = ((x - mu) ** 2).mean(-1, keepdims=True)
        return (x - mu) / jnp.sqrt(var + EPS) * g + b

    patches = _patchify(pixel_values)
    h = patches @ params["patch_w"].astype(f32) + params["patch_b"]
    h = (h + jnp.tile(params["pos_emb"], (B, 1))).reshape(B, NPATCH, HIDDEN)

    for l in range(LAYERS):
        x = ln(h, params["ln1_g"][l], params["ln1_b"][l])
        qkv = x @ params["wqkv"][l].astype(f32) + params["bqkv"][l]
        q = qkv[..., :HIDDEN].reshape(B, NPATCH, HEADS, HEAD_DIM).transpose(0, 2, 1, 3)
        k = qkv[..., HIDDEN:2 * HIDDEN].reshape(B, NPATCH, HEADS, HEAD_DIM).transpose(0, 2, 1, 3)
        v = qkv[..., 2 * HIDDEN:].reshape(B, NPATCH, HEADS, HEAD_DIM).transpose(0, 2, 1, 3)
        s = jnp.einsum("bhqd,bhkd->bhqk", q, k)          # scale folded into Wq
        p = jax.nn.softmax(s, axis=-1)
        o = jnp.einsum("bhqk,bhkd->bhqd", p, v)
        o = o.transpose(0, 2, 1, 3).reshape(B, NPATCH, HIDDEN)
        h = h + (o @ params["wo"][l].astype(f32) + params["bo"][l])
        y = ln(h, params["ln2_g"][l], params["ln2_b"][l])
        y = y @ params["w1"][l].astype(f32) + params["b1"][l]
        y = 0.5 * y * (1.0 + jnp.tanh(0.7978845608028654 * (y + 0.044715 * y ** 3)))
        y = y @ params["w2"][l].astype(f32) + params["b2"][l]
        h = h + y
    return ln(h, params["post_g"], params["post_b"])


# -------------------------------- main ---------------------------------------
if __name__ == "__main__":
    key = jax.random.PRNGKey(0)
    pk, xk = jax.random.split(key)
    params = init_params(pk)
    pixel_values = jax.random.normal(xk, (B, CHANNELS, IMAGE, IMAGE), jnp.float32)

    out = siglip_vision_transformer(pixel_values, params)
    out = jax.block_until_ready(out)
    assert out.shape == (B, NPATCH, HIDDEN) and out.dtype == jnp.float32

    # Correctness sanity-check vs. a pure-JAX f32 reference (bf16 matmul
    # operands + approx reciprocal in the kernel -> loose tolerance).
    ref = _reference_forward(pixel_values, params)
    err = float(jnp.max(jnp.abs(out - ref)))
    assert err < 1e-1, f"max abs err vs reference = {err}"

    print("KERNEL_OK")
</pallas_src>

<mosaic_0001>
module attributes {stable_mosaic.version = 11 : i64} {
  func.func @siglip_fused_kernel(%arg0: memref<32x128xf32, #tpu.memory_space<vmem>>, %arg1: memref<128x128xbf16, #tpu.memory_space<vmem>>, %arg2: memref<1x128xf32, #tpu.memory_space<vmem>>, %arg3: memref<32x128xf32, #tpu.memory_space<vmem>>, %arg4: memref<32x128xf32, #tpu.memory_space<vmem>>, %arg5: memref<128x128xf32, #tpu.memory_space<vmem>>, %arg6: memref<2x1x128xf32, #tpu.memory_space<vmem>>, %arg7: memref<2x1x128xf32, #tpu.memory_space<vmem>>, %arg8: memref<2x128x384xbf16, #tpu.memory_space<vmem>>, %arg9: memref<2x1x384xf32, #tpu.memory_space<vmem>>, %arg10: memref<2x128x128xbf16, #tpu.memory_space<vmem>>, %arg11: memref<2x1x128xf32, #tpu.memory_space<vmem>>, %arg12: memref<2x1x128xf32, #tpu.memory_space<vmem>>, %arg13: memref<2x1x128xf32, #tpu.memory_space<vmem>>, %arg14: memref<2x128x256xbf16, #tpu.memory_space<vmem>>, %arg15: memref<2x1x256xf32, #tpu.memory_space<vmem>>, %arg16: memref<2x256x128xbf16, #tpu.memory_space<vmem>>, %arg17: memref<2x1x128xf32, #tpu.memory_space<vmem>>, %arg18: memref<1x128xf32, #tpu.memory_space<vmem>>, %arg19: memref<1x128xf32, #tpu.memory_space<vmem>>, %arg20: memref<32x128xf32, #tpu.memory_space<vmem>>) attributes {dimension_semantics = [], scalar_prefetch = 0 : i64, scratch_operands = 0 : i64, tpu.core_type = #tpu.core_type<tc>} {
    %c0 = arith.constant 0 : index
    %c0_0 = arith.constant 0 : index
    %0 = vector.load %arg4[%c0, %c0_0] : memref<32x128xf32, #tpu.memory_space<vmem>>, vector<32x128xf32>
    %c0_1 = arith.constant 0 : index
    %c0_2 = arith.constant 0 : index
    %1 = vector.load %arg5[%c0_1, %c0_2] : memref<128x128xf32, #tpu.memory_space<vmem>>, vector<128x128xf32>
    %2 = arith.truncf %1 : vector<128x128xf32> to vector<128x128xbf16>
    %c0_3 = arith.constant 0 : index
    %c0_4 = arith.constant 0 : index
    %3 = vector.load %arg0[%c0_3, %c0_4] : memref<32x128xf32, #tpu.memory_space<vmem>>, vector<32x128xf32>
    %4 = arith.truncf %3 : vector<32x128xf32> to vector<32x128xbf16>
    %c0_5 = arith.constant 0 : index
    %c0_6 = arith.constant 0 : index
    %5 = vector.load %arg1[%c0_5, %c0_6] : memref<128x128xbf16, #tpu.memory_space<vmem>>, vector<128x128xbf16>
    %cst = arith.constant dense<0.000000e+00> : vector<32x128xf32>
    %6 = tpu.matmul %4, %5, %cst {dimension_numbers = #tpu.dot_dimension_numbers<[1], [0], [0], [1], [0, 0, 1, 1], [], []>} : vector<32x128xbf16>, vector<128x128xbf16>, vector<32x128xf32> -> vector<32x128xf32>
    %c0_7 = arith.constant 0 : index
    %c0_8 = arith.constant 0 : index
    %7 = vector.load %arg2[%c0_7, %c0_8] : memref<1x128xf32, #tpu.memory_space<vmem>>, vector<1x128xf32>
    %8 = vector.broadcast %7 : vector<1x128xf32> to vector<32x128xf32>
    %9 = arith.addf %6, %8 : vector<32x128xf32>
    %c0_9 = arith.constant 0 : index
    %c0_10 = arith.constant 0 : index
    %10 = vector.load %arg3[%c0_9, %c0_10] : memref<32x128xf32, #tpu.memory_space<vmem>>, vector<32x128xf32>
    %11 = arith.addf %9, %10 : vector<32x128xf32>
    %c0_11 = arith.constant 0 : index
    %c0_12 = arith.constant 0 : index
    %c0_13 = arith.constant 0 : index
    %12 = vector.load %arg6[%c0_11, %c0_12, %c0_13] : memref<2x1x128xf32, #tpu.memory_space<vmem>>, vector<1x1x128xf32>
    %13 = vector.shape_cast %12 : vector<1x1x128xf32> to vector<1x128xf32>
    %c0_14 = arith.constant 0 : index
    %c0_15 = arith.constant 0 : index
    %c0_16 = arith.constant 0 : index
    %14 = vector.load %arg7[%c0_14, %c0_15, %c0_16] : memref<2x1x128xf32, #tpu.memory_space<vmem>>, vector<1x1x128xf32>
    %15 = vector.shape_cast %14 : vector<1x1x128xf32> to vector<1x128xf32>
    %cst_17 = arith.constant dense<0.000000e+00> : vector<32xf32>
    %16 = vector.multi_reduction <add>, %11, %cst_17 [1] : vector<32x128xf32> to vector<32xf32>
    %17 = vector.shape_cast %16 : vector<32xf32> to vector<32x1xf32>
    %cst_18 = arith.constant 1.280000e+02 : f32
    %18 = vector.broadcast %cst_18 : f32 to vector<32x1xf32>
    %19 = arith.divf %17, %18 : vector<32x1xf32>
    %20 = vector.broadcast %19 : vector<32x1xf32> to vector<32x128xf32>
    %21 = arith.subf %11, %20 : vector<32x128xf32>
    %22 = arith.mulf %21, %21 : vector<32x128xf32>
    %cst_19 = arith.constant dense<0.000000e+00> : vector<32xf32>
    %23 = vector.multi_reduction <add>, %22, %cst_19 [1] : vector<32x128xf32> to vector<32xf32>
    %24 = vector.shape_cast %23 : vector<32xf32> to vector<32x1xf32>
    %cst_20 = arith.constant 1.280000e+02 : f32
    %25 = vector.broadcast %cst_20 : f32 to vector<32x1xf32>
    %26 = arith.divf %24, %25 : vector<32x1xf32>
    %cst_21 = arith.constant 9.99999997E-7 : f32
    %27 = vector.broadcast %cst_21 : f32 to vector<32x1xf32>
    %28 = arith.addf %26, %27 : vector<32x1xf32>
    %29 = math.rsqrt %28 : vector<32x1xf32>
    %30 = vector.broadcast %29 : vector<32x1xf32> to vector<32x128xf32>
    %31 = arith.mulf %21, %30 : vector<32x128xf32>
    %32 = vector.broadcast %13 : vector<1x128xf32> to vector<32x128xf32>
    %33 = arith.mulf %31, %32 : vector<32x128xf32>
    %34 = vector.broadcast %15 : vector<1x128xf32> to vector<32x128xf32>
    %35 = arith.addf %33, %34 : vector<32x128xf32>
    %36 = arith.truncf %35 : vector<32x128xf32> to vector<32x128xbf16>
    %c0_22 = arith.constant 0 : index
    %c0_23 = arith.constant 0 : index
    %c0_24 = arith.constant 0 : index
    %37 = vector.load %arg8[%c0_22, %c0_23, %c0_24] : memref<2x128x384xbf16, #tpu.memory_space<vmem>>, vector<1x128x384xbf16>
    %38 = vector.shape_cast %37 : vector<1x128x384xbf16> to vector<128x384xbf16>
    %cst_25 = arith.constant dense<0.000000e+00> : vector<32x384xf32>
    %39 = tpu.matmul %36, %38, %cst_25 {dimension_numbers = #tpu.dot_dimension_numbers<[1], [0], [0], [1], [0, 0, 1, 1], [], []>} : vector<32x128xbf16>, vector<128x384xbf16>, vector<32x384xf32> -> vector<32x384xf32>
    %c0_26 = arith.constant 0 : index
    %c0_27 = arith.constant 0 : index
    %c0_28 = arith.constant 0 : index
    %40 = vector.load %arg9[%c0_26, %c0_27, %c0_28] : memref<2x1x384xf32, #tpu.memory_space<vmem>>, vector<1x1x384xf32>
    %41 = vector.shape_cast %40 : vector<1x1x384xf32> to vector<1x384xf32>
    %42 = vector.broadcast %41 : vector<1x384xf32> to vector<32x384xf32>
    %43 = arith.addf %39, %42 : vector<32x384xf32>
    %44 = vector.extract_strided_slice %43 {offsets = [0, 0], sizes = [32, 128], strides = [1, 1]} : vector<32x384xf32> to vector<32x128xf32>
    %45 = arith.truncf %44 : vector<32x128xf32> to vector<32x128xbf16>
    %46 = vector.extract_strided_slice %43 {offsets = [0, 128], sizes = [32, 128], strides = [1, 1]} : vector<32x384xf32> to vector<32x128xf32>
    %47 = arith.truncf %46 : vector<32x128xf32> to vector<32x128xbf16>
    %48 = vector.extract_strided_slice %43 {offsets = [0, 256], sizes = [32, 128], strides = [1, 1]} : vector<32x384xf32> to vector<32x128xf32>
    %49 = arith.truncf %48 : vector<32x128xf32> to vector<32x128xbf16>
    %50 = tpu.concatenate %47, %47, %47, %47 in 0 : vector<32x128xbf16>, vector<32x128xbf16>, vector<32x128xbf16>, vector<32x128xbf16> -> vector<128x128xbf16>
    %51 = arith.mulf %50, %2 : vector<128x128xbf16>
    %52 = tpu.concatenate %49, %49, %49, %49 in 0 : vector<32x128xbf16>, vector<32x128xbf16>, vector<32x128xbf16>, vector<32x128xbf16> -> vector<128x128xbf16>
    %53 = arith.mulf %52, %2 : vector<128x128xbf16>
    %cst_29 = arith.constant dense<0.000000e+00> : vector<32x128xf32>
    %54 = tpu.matmul %45, %51, %cst_29 {dimension_numbers = #tpu.dot_dimension_numbers<[1], [1], [0], [0], [0, 0, 1, 0], [], []>} : vector<32x128xbf16>, vector<128x128xbf16>, vector<32x128xf32> -> vector<32x128xf32>
    %55 = arith.addf %54, %0 : vector<32x128xf32>
    %cst_30 = arith.constant dense<0xFF800000> : vector<32xf32>
    %56 = vector.multi_reduction <maximumf>, %55, %cst_30 [1] : vector<32x128xf32> to vector<32xf32>
    %57 = vector.shape_cast %56 : vector<32xf32> to vector<32x1xf32>
    %58 = vector.broadcast %57 : vector<32x1xf32> to vector<32x128xf32>
    %59 = arith.subf %55, %58 : vector<32x128xf32>
    %60 = math.exp %59 : vector<32x128xf32>
    %cst_31 = arith.constant dense<0.000000e+00> : vector<32x128xf32>
    %61 = tpu.matmul %60, %1, %cst_31 {dimension_numbers = #tpu.dot_dimension_numbers<[1], [0], [0], [1], [0, 0, 1, 1], [], []>} : vector<32x128xf32>, vector<128x128xf32>, vector<32x128xf32> -> vector<32x128xf32>
    %62 = tpu.reciprocal %61 {approx = true} : vector<32x128xf32> -> vector<32x128xf32>
    %63 = arith.mulf %60, %62 : vector<32x128xf32>
    %64 = arith.truncf %63 : vector<32x128xf32> to vector<32x128xbf16>
    %cst_32 = arith.constant dense<0.000000e+00> : vector<32x128xf32>
    %65 = tpu.matmul %64, %53, %cst_32 {dimension_numbers = #tpu.dot_dimension_numbers<[1], [0], [0], [1], [0, 0, 1, 1], [], []>} : vector<32x128xbf16>, vector<128x128xbf16>, vector<32x128xf32> -> vector<32x128xf32>
    %66 = arith.truncf %65 : vector<32x128xf32> to vector<32x128xbf16>
    %c0_33 = arith.constant 0 : index
    %c0_34 = arith.constant 0 : index
    %c0_35 = arith.constant 0 : index
    %67 = vector.load %arg10[%c0_33, %c0_34, %c0_35] : memref<2x128x128xbf16, #tpu.memory_space<vmem>>, vector<1x128x128xbf16>
    %68 = vector.shape_cast %67 : vector<1x128x128xbf16> to vector<128x128xbf16>
    %cst_36 = arith.constant dense<0.000000e+00> : vector<32x128xf32>
    %69 = tpu.matmul %66, %68, %cst_36 {dimension_numbers = #tpu.dot_dimension_numbers<[1], [0], [0], [1], [0, 0, 1, 1], [], []>} : vector<32x128xbf16>, vector<128x128xbf16>, vector<32x128xf32> -> vector<32x128xf32>
    %c0_37 = arith.constant 0 : index
    %c0_38 = arith.constant 0 : index
    %c0_39 = arith.constant 0 : index
    %70 = vector.load %arg11[%c0_37, %c0_38, %c0_39] : memref<2x1x128xf32, #tpu.memory_space<vmem>>, vector<1x1x128xf32>
    %71 = vector.shape_cast %70 : vector<1x1x128xf32> to vector<1x128xf32>
    %72 = vector.broadcast %71 : vector<1x128xf32> to vector<32x128xf32>
    %73 = arith.addf %69, %72 : vector<32x128xf32>
    %74 = arith.addf %11, %73 : vector<32x128xf32>
    %c0_40 = arith.constant 0 : index
    %c0_41 = arith.constant 0 : index
    %c0_42 = arith.constant 0 : index
    %75 = vector.load %arg12[%c0_40, %c0_41, %c0_42] : memref<2x1x128xf32, #tpu.memory_space<vmem>>, vector<1x1x128xf32>
    %76 = vector.shape_cast %75 : vector<1x1x128xf32> to vector<1x128xf32>
    %c0_43 = arith.constant 0 : index
    %c0_44 = arith.constant 0 : index
    %c0_45 = arith.constant 0 : index
    %77 = vector.load %arg13[%c0_43, %c0_44, %c0_45] : memref<2x1x128xf32, #tpu.memory_space<vmem>>, vector<1x1x128xf32>
    %78 = vector.shape_cast %77 : vector<1x1x128xf32> to vector<1x128xf32>
    %cst_46 = arith.constant dense<0.000000e+00> : vector<32xf32>
    %79 = vector.multi_reduction <add>, %74, %cst_46 [1] : vector<32x128xf32> to vector<32xf32>
    %80 = vector.shape_cast %79 : vector<32xf32> to vector<32x1xf32>
    %cst_47 = arith.constant 1.280000e+02 : f32
    %81 = vector.broadcast %cst_47 : f32 to vector<32x1xf32>
    %82 = arith.divf %80, %81 : vector<32x1xf32>
    %83 = vector.broadcast %82 : vector<32x1xf32> to vector<32x128xf32>
    %84 = arith.subf %74, %83 : vector<32x128xf32>
    %85 = arith.mulf %84, %84 : vector<32x128xf32>
    %cst_48 = arith.constant dense<0.000000e+00> : vector<32xf32>
    %86 = vector.multi_reduction <add>, %85, %cst_48 [1] : vector<32x128xf32> to vector<32xf32>
    %87 = vector.shape_cast %86 : vector<32xf32> to vector<32x1xf32>
    %cst_49 = arith.constant 1.280000e+02 : f32
    %88 = vector.broadcast %cst_49 : f32 to vector<32x1xf32>
    %89 = arith.divf %87, %88 : vector<32x1xf32>
    %cst_50 = arith.constant 9.99999997E-7 : f32
    %90 = vector.broadcast %cst_50 : f32 to vector<32x1xf32>
    %91 = arith.addf %89, %90 : vector<32x1xf32>
    %92 = math.rsqrt %91 : vector<32x1xf32>
    %93 = vector.broadcast %92 : vector<32x1xf32> to vector<32x128xf32>
    %94 = arith.mulf %84, %93 : vector<32x128xf32>
    %95 = vector.broadcast %76 : vector<1x128xf32> to vector<32x128xf32>
    %96 = arith.mulf %94, %95 : vector<32x128xf32>
    %97 = vector.broadcast %78 : vector<1x128xf32> to vector<32x128xf32>
    %98 = arith.addf %96, %97 : vector<32x128xf32>
    %99 = arith.truncf %98 : vector<32x128xf32> to vector<32x128xbf16>
    %c0_51 = arith.constant 0 : index
    %c0_52 = arith.constant 0 : index
    %c0_53 = arith.constant 0 : index
    %100 = vector.load %arg14[%c0_51, %c0_52, %c0_53] : memref<2x128x256xbf16, #tpu.memory_space<vmem>>, vector<1x128x256xbf16>
    %101 = vector.shape_cast %100 : vector<1x128x256xbf16> to vector<128x256xbf16>
    %cst_54 = arith.constant dense<0.000000e+00> : vector<32x256xf32>
    %102 = tpu.matmul %99, %101, %cst_54 {dimension_numbers = #tpu.dot_dimension_numbers<[1], [0], [0], [1], [0, 0, 1, 1], [], []>} : vector<32x128xbf16>, vector<128x256xbf16>, vector<32x256xf32> -> vector<32x256xf32>
    %c0_55 = arith.constant 0 : index
    %c0_56 = arith.constant 0 : index
    %c0_57 = arith.constant 0 : index
    %103 = vector.load %arg15[%c0_55, %c0_56, %c0_57] : memref<2x1x256xf32, #tpu.memory_space<vmem>>, vector<1x1x256xf32>
    %104 = vector.shape_cast %103 : vector<1x1x256xf32> to vector<1x256xf32>
    %105 = vector.broadcast %104 : vector<1x256xf32> to vector<32x256xf32>
    %106 = arith.addf %102, %105 : vector<32x256xf32>
    %cst_58 = arith.constant 5.000000e-01 : f32
    %107 = vector.broadcast %cst_58 : f32 to vector<32x256xf32>
    %108 = arith.mulf %107, %106 : vector<32x256xf32>
    %cst_59 = arith.constant 4.471500e-02 : f32
    %109 = vector.broadcast %cst_59 : f32 to vector<32x256xf32>
    %110 = arith.mulf %109, %106 : vector<32x256xf32>
    %111 = arith.mulf %110, %106 : vector<32x256xf32>
    %112 = arith.mulf %111, %106 : vector<32x256xf32>
    %113 = arith.addf %106, %112 : vector<32x256xf32>
    %cst_60 = arith.constant 0.797884583 : f32
    %114 = vector.broadcast %cst_60 : f32 to vector<32x256xf32>
    %115 = arith.mulf %114, %113 : vector<32x256xf32>
    %116 = math.tanh %115 : vector<32x256xf32>
    %cst_61 = arith.constant 1.000000e+00 : f32
    %117 = vector.broadcast %cst_61 : f32 to vector<32x256xf32>
    %118 = arith.addf %117, %116 : vector<32x256xf32>
    %119 = arith.mulf %108, %118 : vector<32x256xf32>
    %120 = arith.truncf %119 : vector<32x256xf32> to vector<32x256xbf16>
    %c0_62 = arith.constant 0 : index
    %c0_63 = arith.constant 0 : index
    %c0_64 = arith.constant 0 : index
    %121 = vector.load %arg16[%c0_62, %c0_63, %c0_64] : memref<2x256x128xbf16, #tpu.memory_space<vmem>>, vector<1x256x128xbf16>
    %122 = vector.shape_cast %121 : vector<1x256x128xbf16> to vector<256x128xbf16>
    %cst_65 = arith.constant dense<0.000000e+00> : vector<32x128xf32>
    %123 = tpu.matmul %120, %122, %cst_65 {dimension_numbers = #tpu.dot_dimension_numbers<[1], [0], [0], [1], [0, 0, 1, 1], [], []>} : vector<32x256xbf16>, vector<256x128xbf16>, vector<32x128xf32> -> vector<32x128xf32>
    %c0_66 = arith.constant 0 : index
    %c0_67 = arith.constant 0 : index
    %c0_68 = arith.constant 0 : index
    %124 = vector.load %arg17[%c0_66, %c0_67, %c0_68] : memref<2x1x128xf32, #tpu.memory_space<vmem>>, vector<1x1x128xf32>
    %125 = vector.shape_cast %124 : vector<1x1x128xf32> to vector<1x128xf32>
    %126 = vector.broadcast %125 : vector<1x128xf32> to vector<32x128xf32>
    %127 = arith.addf %123, %126 : vector<32x128xf32>
    %128 = arith.addf %74, %127 : vector<32x128xf32>
    %c1 = arith.constant 1 : index
    %c0_69 = arith.constant 0 : index
    %c0_70 = arith.constant 0 : index
    %129 = vector.load %arg6[%c1, %c0_69, %c0_70] : memref<2x1x128xf32, #tpu.memory_space<vmem>>, vector<1x1x128xf32>
    %130 = vector.shape_cast %129 : vector<1x1x128xf32> to vector<1x128xf32>
    %c1_71 = arith.constant 1 : index
    %c0_72 = arith.constant 0 : index
    %c0_73 = arith.constant 0 : index
    %131 = vector.load %arg7[%c1_71, %c0_72, %c0_73] : memref<2x1x128xf32, #tpu.memory_space<vmem>>, vector<1x1x128xf32>
    %132 = vector.shape_cast %131 : vector<1x1x128xf32> to vector<1x128xf32>
    %cst_74 = arith.constant dense<0.000000e+00> : vector<32xf32>
    %133 = vector.multi_reduction <add>, %128, %cst_74 [1] : vector<32x128xf32> to vector<32xf32>
    %134 = vector.shape_cast %133 : vector<32xf32> to vector<32x1xf32>
    %cst_75 = arith.constant 1.280000e+02 : f32
    %135 = vector.broadcast %cst_75 : f32 to vector<32x1xf32>
    %136 = arith.divf %134, %135 : vector<32x1xf32>
    %137 = vector.broadcast %136 : vector<32x1xf32> to vector<32x128xf32>
    %138 = arith.subf %128, %137 : vector<32x128xf32>
    %139 = arith.mulf %138, %138 : vector<32x128xf32>
    %cst_76 = arith.constant dense<0.000000e+00> : vector<32xf32>
    %140 = vector.multi_reduction <add>, %139, %cst_76 [1] : vector<32x128xf32> to vector<32xf32>
    %141 = vector.shape_cast %140 : vector<32xf32> to vector<32x1xf32>
    %cst_77 = arith.constant 1.280000e+02 : f32
    %142 = vector.broadcast %cst_77 : f32 to vector<32x1xf32>
    %143 = arith.divf %141, %142 : vector<32x1xf32>
    %cst_78 = arith.constant 9.99999997E-7 : f32
    %144 = vector.broadcast %cst_78 : f32 to vector<32x1xf32>
    %145 = arith.addf %143, %144 : vector<32x1xf32>
    %146 = math.rsqrt %145 : vector<32x1xf32>
    %147 = vector.broadcast %146 : vector<32x1xf32> to vector<32x128xf32>
    %148 = arith.mulf %138, %147 : vector<32x128xf32>
    %149 = vector.broadcast %130 : vector<1x128xf32> to vector<32x128xf32>
    %150 = arith.mulf %148, %149 : vector<32x128xf32>
    %151 = vector.broadcast %132 : vector<1x128xf32> to vector<32x128xf32>
    %152 = arith.addf %150, %151 : vector<32x128xf32>
    %153 = arith.truncf %152 : vector<32x128xf32> to vector<32x128xbf16>
    %c1_79 = arith.constant 1 : index
    %c0_80 = arith.constant 0 : index
    %c0_81 = arith.constant 0 : index
    %154 = vector.load %arg8[%c1_79, %c0_80, %c0_81] : memref<2x128x384xbf16, #tpu.memory_space<vmem>>, vector<1x128x384xbf16>
    %155 = vector.shape_cast %154 : vector<1x128x384xbf16> to vector<128x384xbf16>
    %cst_82 = arith.constant dense<0.000000e+00> : vector<32x384xf32>
    %156 = tpu.matmul %153, %155, %cst_82 {dimension_numbers = #tpu.dot_dimension_numbers<[1], [0], [0], [1], [0, 0, 1, 1], [], []>} : vector<32x128xbf16>, vector<128x384xbf16>, vector<32x384xf32> -> vector<32x384xf32>
    %c1_83 = arith.constant 1 : index
    %c0_84 = arith.constant 0 : index
    %c0_85 = arith.constant 0 : index
    %157 = vector.load %arg9[%c1_83, %c0_84, %c0_85] : memref<2x1x384xf32, #tpu.memory_space<vmem>>, vector<1x1x384xf32>
    %158 = vector.shape_cast %157 : vector<1x1x384xf32> to vector<1x384xf32>
    %159 = vector.broadcast %158 : vector<1x384xf32> to vector<32x384xf32>
    %160 = arith.addf %156, %159 : vector<32x384xf32>
    %161 = vector.extract_strided_slice %160 {offsets = [0, 0], sizes = [32, 128], strides = [1, 1]} : vector<32x384xf32> to vector<32x128xf32>
    %162 = arith.truncf %161 : vector<32x128xf32> to vector<32x128xbf16>
    %163 = vector.extract_strided_slice %160 {offsets = [0, 128], sizes = [32, 128], strides = [1, 1]} : vector<32x384xf32> to vector<32x128xf32>
    %164 = arith.truncf %163 : vector<32x128xf32> to vector<32x128xbf16>
    %165 = vector.extract_strided_slice %160 {offsets = [0, 256], sizes = [32, 128], strides = [1, 1]} : vector<32x384xf32> to vector<32x128xf32>
    %166 = arith.truncf %165 : vector<32x128xf32> to vector<32x128xbf16>
    %167 = tpu.concatenate %164, %164, %164, %164 in 0 : vector<32x128xbf16>, vector<32x128xbf16>, vector<32x128xbf16>, vector<32x128xbf16> -> vector<128x128xbf16>
    %168 = arith.mulf %167, %2 : vector<128x128xbf16>
    %169 = tpu.concatenate %166, %166, %166, %166 in 0 : vector<32x128xbf16>, vector<32x128xbf16>, vector<32x128xbf16>, vector<32x128xbf16> -> vector<128x128xbf16>
    %170 = arith.mulf %169, %2 : vector<128x128xbf16>
    %cst_86 = arith.constant dense<0.000000e+00> : vector<32x128xf32>
    %171 = tpu.matmul %162, %168, %cst_86 {dimension_numbers = #tpu.dot_dimension_numbers<[1], [1], [0], [0], [0, 0, 1, 0], [], []>} : vector<32x128xbf16>, vector<128x128xbf16>, vector<32x128xf32> -> vector<32x128xf32>
    %172 = arith.addf %171, %0 : vector<32x128xf32>
    %cst_87 = arith.constant dense<0xFF800000> : vector<32xf32>
    %173 = vector.multi_reduction <maximumf>, %172, %cst_87 [1] : vector<32x128xf32> to vector<32xf32>
    %174 = vector.shape_cast %173 : vector<32xf32> to vector<32x1xf32>
    %175 = vector.broadcast %174 : vector<32x1xf32> to vector<32x128xf32>
    %176 = arith.subf %172, %175 : vector<32x128xf32>
    %177 = math.exp %176 : vector<32x128xf32>
    %cst_88 = arith.constant dense<0.000000e+00> : vector<32x128xf32>
    %178 = tpu.matmul %177, %1, %cst_88 {dimension_numbers = #tpu.dot_dimension_numbers<[1], [0], [0], [1], [0, 0, 1, 1], [], []>} : vector<32x128xf32>, vector<128x128xf32>, vector<32x128xf32> -> vector<32x128xf32>
    %179 = tpu.reciprocal %178 {approx = true} : vector<32x128xf32> -> vector<32x128xf32>
    %180 = arith.mulf %177, %179 : vector<32x128xf32>
    %181 = arith.truncf %180 : vector<32x128xf32> to vector<32x128xbf16>
    %cst_89 = arith.constant dense<0.000000e+00> : vector<32x128xf32>
    %182 = tpu.matmul %181, %170, %cst_89 {dimension_numbers = #tpu.dot_dimension_numbers<[1], [0], [0], [1], [0, 0, 1, 1], [], []>} : vector<32x128xbf16>, vector<128x128xbf16>, vector<32x128xf32> -> vector<32x128xf32>
    %183 = arith.truncf %182 : vector<32x128xf32> to vector<32x128xbf16>
    %c1_90 = arith.constant 1 : index
    %c0_91 = arith.constant 0 : index
    %c0_92 = arith.constant 0 : index
    %184 = vector.load %arg10[%c1_90, %c0_91, %c0_92] : memref<2x128x128xbf16, #tpu.memory_space<vmem>>, vector<1x128x128xbf16>
    %185 = vector.shape_cast %184 : vector<1x128x128xbf16> to vector<128x128xbf16>
    %cst_93 = arith.constant dense<0.000000e+00> : vector<32x128xf32>
    %186 = tpu.matmul %183, %185, %cst_93 {dimension_numbers = #tpu.dot_dimension_numbers<[1], [0], [0], [1], [0, 0, 1, 1], [], []>} : vector<32x128xbf16>, vector<128x128xbf16>, vector<32x128xf32> -> vector<32x128xf32>
    %c1_94 = arith.constant 1 : index
    %c0_95 = arith.constant 0 : index
    %c0_96 = arith.constant 0 : index
    %187 = vector.load %arg11[%c1_94, %c0_95, %c0_96] : memref<2x1x128xf32, #tpu.memory_space<vmem>>, vector<1x1x128xf32>
    %188 = vector.shape_cast %187 : vector<1x1x128xf32> to vector<1x128xf32>
    %189 = vector.broadcast %188 : vector<1x128xf32> to vector<32x128xf32>
    %190 = arith.addf %186, %189 : vector<32x128xf32>
    %191 = arith.addf %128, %190 : vector<32x128xf32>
    %c1_97 = arith.constant 1 : index
    %c0_98 = arith.constant 0 : index
    %c0_99 = arith.constant 0 : index
    %192 = vector.load %arg12[%c1_97, %c0_98, %c0_99] : memref<2x1x128xf32, #tpu.memory_space<vmem>>, vector<1x1x128xf32>
    %193 = vector.shape_cast %192 : vector<1x1x128xf32> to vector<1x128xf32>
    %c1_100 = arith.constant 1 : index
    %c0_101 = arith.constant 0 : index
    %c0_102 = arith.constant 0 : index
    %194 = vector.load %arg13[%c1_100, %c0_101, %c0_102] : memref<2x1x128xf32, #tpu.memory_space<vmem>>, vector<1x1x128xf32>
    %195 = vector.shape_cast %194 : vector<1x1x128xf32> to vector<1x128xf32>
    %cst_103 = arith.constant dense<0.000000e+00> : vector<32xf32>
    %196 = vector.multi_reduction <add>, %191, %cst_103 [1] : vector<32x128xf32> to vector<32xf32>
    %197 = vector.shape_cast %196 : vector<32xf32> to vector<32x1xf32>
    %cst_104 = arith.constant 1.280000e+02 : f32
    %198 = vector.broadcast %cst_104 : f32 to vector<32x1xf32>
    %199 = arith.divf %197, %198 : vector<32x1xf32>
    %200 = vector.broadcast %199 : vector<32x1xf32> to vector<32x128xf32>
    %201 = arith.subf %191, %200 : vector<32x128xf32>
    %202 = arith.mulf %201, %201 : vector<32x128xf32>
    %cst_105 = arith.constant dense<0.000000e+00> : vector<32xf32>
    %203 = vector.multi_reduction <add>, %202, %cst_105 [1] : vector<32x128xf32> to vector<32xf32>
    %204 = vector.shape_cast %203 : vector<32xf32> to vector<32x1xf32>
    %cst_106 = arith.constant 1.280000e+02 : f32
    %205 = vector.broadcast %cst_106 : f32 to vector<32x1xf32>
    %206 = arith.divf %204, %205 : vector<32x1xf32>
    %cst_107 = arith.constant 9.99999997E-7 : f32
    %207 = vector.broadcast %cst_107 : f32 to vector<32x1xf32>
    %208 = arith.addf %206, %207 : vector<32x1xf32>
    %209 = math.rsqrt %208 : vector<32x1xf32>
    %210 = vector.broadcast %209 : vector<32x1xf32> to vector<32x128xf32>
    %211 = arith.mulf %201, %210 : vector<32x128xf32>
    %212 = vector.broadcast %193 : vector<1x128xf32> to vector<32x128xf32>
    %213 = arith.mulf %211, %212 : vector<32x128xf32>
    %214 = vector.broadcast %195 : vector<1x128xf32> to vector<32x128xf32>
    %215 = arith.addf %213, %214 : vector<32x128xf32>
    %216 = arith.truncf %215 : vector<32x128xf32> to vector<32x128xbf16>
    %c1_108 = arith.constant 1 : index
    %c0_109 = arith.constant 0 : index
    %c0_110 = arith.constant 0 : index
    %217 = vector.load %arg14[%c1_108, %c0_109, %c0_110] : memref<2x128x256xbf16, #tpu.memory_space<vmem>>, vector<1x128x256xbf16>
    %218 = vector.shape_cast %217 : vector<1x128x256xbf16> to vector<128x256xbf16>
    %cst_111 = arith.constant dense<0.000000e+00> : vector<32x256xf32>
    %219 = tpu.matmul %216, %218, %cst_111 {dimension_numbers = #tpu.dot_dimension_numbers<[1], [0], [0], [1], [0, 0, 1, 1], [], []>} : vector<32x128xbf16>, vector<128x256xbf16>, vector<32x256xf32> -> vector<32x256xf32>
    %c1_112 = arith.constant 1 : index
    %c0_113 = arith.constant 0 : index
    %c0_114 = arith.constant 0 : index
    %220 = vector.load %arg15[%c1_112, %c0_113, %c0_114] : memref<2x1x256xf32, #tpu.memory_space<vmem>>, vector<1x1x256xf32>
    %221 = vector.shape_cast %220 : vector<1x1x256xf32> to vector<1x256xf32>
    %222 = vector.broadcast %221 : vector<1x256xf32> to vector<32x256xf32>
    %223 = arith.addf %219, %222 : vector<32x256xf32>
    %cst_115 = arith.constant 5.000000e-01 : f32
    %224 = vector.broadcast %cst_115 : f32 to vector<32x256xf32>
    %225 = arith.mulf %224, %223 : vector<32x256xf32>
    %cst_116 = arith.constant 4.471500e-02 : f32
    %226 = vector.broadcast %cst_116 : f32 to vector<32x256xf32>
    %227 = arith.mulf %226, %223 : vector<32x256xf32>
    %228 = arith.mulf %227, %223 : vector<32x256xf32>
    %229 = arith.mulf %228, %223 : vector<32x256xf32>
    %230 = arith.addf %223, %229 : vector<32x256xf32>
    %cst_117 = arith.constant 0.797884583 : f32
    %231 = vector.broadcast %cst_117 : f32 to vector<32x256xf32>
    %232 = arith.mulf %231, %230 : vector<32x256xf32>
    %233 = math.tanh %232 : vector<32x256xf32>
    %cst_118 = arith.constant 1.000000e+00 : f32
    %234 = vector.broadcast %cst_118 : f32 to vector<32x256xf32>
    %235 = arith.addf %234, %233 : vector<32x256xf32>
    %236 = arith.mulf %225, %235 : vector<32x256xf32>
    %237 = arith.truncf %236 : vector<32x256xf32> to vector<32x256xbf16>
    %c1_119 = arith.constant 1 : index
    %c0_120 = arith.constant 0 : index
    %c0_121 = arith.constant 0 : index
    %238 = vector.load %arg16[%c1_119, %c0_120, %c0_121] : memref<2x256x128xbf16, #tpu.memory_space<vmem>>, vector<1x256x128xbf16>
    %239 = vector.shape_cast %238 : vector<1x256x128xbf16> to vector<256x128xbf16>
    %cst_122 = arith.constant dense<0.000000e+00> : vector<32x128xf32>
    %240 = tpu.matmul %237, %239, %cst_122 {dimension_numbers = #tpu.dot_dimension_numbers<[1], [0], [0], [1], [0, 0, 1, 1], [], []>} : vector<32x256xbf16>, vector<256x128xbf16>, vector<32x128xf32> -> vector<32x128xf32>
    %c1_123 = arith.constant 1 : index
    %c0_124 = arith.constant 0 : index
    %c0_125 = arith.constant 0 : index
    %241 = vector.load %arg17[%c1_123, %c0_124, %c0_125] : memref<2x1x128xf32, #tpu.memory_space<vmem>>, vector<1x1x128xf32>
    %242 = vector.shape_cast %241 : vector<1x1x128xf32> to vector<1x128xf32>
    %243 = vector.broadcast %242 : vector<1x128xf32> to vector<32x128xf32>
    %244 = arith.addf %240, %243 : vector<32x128xf32>
    %245 = arith.addf %191, %244 : vector<32x128xf32>
    %c0_126 = arith.constant 0 : index
    %c0_127 = arith.constant 0 : index
    %246 = vector.load %arg18[%c0_126, %c0_127] : memref<1x128xf32, #tpu.memory_space<vmem>>, vector<1x128xf32>
    %c0_128 = arith.constant 0 : index
    %c0_129 = arith.constant 0 : index
    %247 = vector.load %arg19[%c0_128, %c0_129] : memref<1x128xf32, #tpu.memory_space<vmem>>, vector<1x128xf32>
    %cst_130 = arith.constant dense<0.000000e+00> : vector<32xf32>
    %248 = vector.multi_reduction <add>, %245, %cst_130 [1] : vector<32x128xf32> to vector<32xf32>
    %249 = vector.shape_cast %248 : vector<32xf32> to vector<32x1xf32>
    %cst_131 = arith.constant 1.280000e+02 : f32
    %250 = vector.broadcast %cst_131 : f32 to vector<32x1xf32>
    %251 = arith.divf %249, %250 : vector<32x1xf32>
    %252 = vector.broadcast %251 : vector<32x1xf32> to vector<32x128xf32>
    %253 = arith.subf %245, %252 : vector<32x128xf32>
    %254 = arith.mulf %253, %253 : vector<32x128xf32>
    %cst_132 = arith.constant dense<0.000000e+00> : vector<32xf32>
    %255 = vector.multi_reduction <add>, %254, %cst_132 [1] : vector<32x128xf32> to vector<32xf32>
    %256 = vector.shape_cast %255 : vector<32xf32> to vector<32x1xf32>
    %cst_133 = arith.constant 1.280000e+02 : f32
    %257 = vector.broadcast %cst_133 : f32 to vector<32x1xf32>
    %258 = arith.divf %256, %257 : vector<32x1xf32>
    %cst_134 = arith.constant 9.99999997E-7 : f32
    %259 = vector.broadcast %cst_134 : f32 to vector<32x1xf32>
    %260 = arith.addf %258, %259 : vector<32x1xf32>
    %261 = math.rsqrt %260 : vector<32x1xf32>
    %262 = vector.broadcast %261 : vector<32x1xf32> to vector<32x128xf32>
    %263 = arith.mulf %253, %262 : vector<32x128xf32>
    %264 = vector.broadcast %246 : vector<1x128xf32> to vector<32x128xf32>
    %265 = arith.mulf %263, %264 : vector<32x128xf32>
    %266 = vector.broadcast %247 : vector<1x128xf32> to vector<32x128xf32>
    %267 = arith.addf %265, %266 : vector<32x128xf32>
    %c0_135 = arith.constant 0 : index
    %c0_136 = arith.constant 0 : index
    %268 = vector.load %arg20[%c0_135, %c0_136] : memref<32x128xf32, #tpu.memory_space<vmem>>, vector<32x128xf32>
    tpu.vector_store %arg20[%c0_135, %c0_136], %267 {strides = array<i32>} : memref<32x128xf32, #tpu.memory_space<vmem>>, vector<32x128xf32>,
    return
  }
}

</mosaic_0001>

<bundles_post_ra>
// kernel: siglip_vision_transformer.1
= control target key start
LH: loop header
LB: loop body
LE: loop exit
PB: predicated region body
PF: predicated region fallthrough
CT: control target
= control target key end

     0   :  { %s4827_s0 = inlined_call_operand.vmem [shape: f32[32,128], index: 0, kind: input, shape index: {}]   ;;  %s4828_s1 = inlined_call_operand.vmem [shape: bf16[128,128], index: 1, kind: input, shape index: {}]   ;;  %s4829_s2 = inlined_call_operand.vmem [shape: f32[1,128], index: 2, kind: input, shape index: {}]   ;;  %s4830_s3 = inlined_call_operand.vmem [shape: f32[32,128], index: 3, kind: input, shape index: {}]   ;;  %s4831_s4 = inlined_call_operand.vmem [shape: f32[32,128], index: 4, kind: input, shape index: {}]   ;;  %s4832_s5 = inlined_call_operand.vmem [shape: f32[128,128], index: 5, kind: input, shape index: {}]   ;;  %s4833_s6 = inlined_call_operand.vmem [shape: f32[2,1,128], index: 6, kind: input, shape index: {}]   ;;  %s4834_s7 = inlined_call_operand.vmem [shape: f32[2,1,128], index: 7, kind: input, shape index: {}]   ;;  %s4835_s8 = inlined_call_operand.vmem [shape: bf16[2,128,384], index: 8, kind: input, shape index: {}]   ;;  %s4836_s9 = inlined_call_operand.vmem [shape: f32[2,1,384], index: 9, kind: input, shape index: {}]   ;;  %s4837_s10 = inlined_call_operand.vmem [shape: bf16[2,128,128], index: 10, kind: input, shape index: {}]   ;;  %s4838_s11 = inlined_call_operand.vmem [shape: f32[2,1,128], index: 11, kind: input, shape index: {}]   ;;  %s4839_s12 = inlined_call_operand.vmem [shape: f32[2,1,128], index: 12, kind: input, shape index: {}]   ;;  %s4840_s13 = inlined_call_operand.vmem [shape: f32[2,1,128], index: 13, kind: input, shape index: {}]   ;;  %s4841_s14 = inlined_call_operand.vmem [shape: bf16[2,128,256], index: 14, kind: input, shape index: {}]   ;;  %s4842_s15 = inlined_call_operand.vmem [shape: f32[2,1,256], index: 15, kind: input, shape index: {}]   ;;  %s4843_s16 = inlined_call_operand.vmem [shape: bf16[2,256,128], index: 16, kind: input, shape index: {}]   ;;  %s4844_s17 = inlined_call_operand.vmem [shape: f32[2,1,128], index: 17, kind: input, shape index: {}]   ;;  %s4845_s18 = inlined_call_operand.vmem [shape: f32[1,128], index: 18, kind: input, shape index: {}]   ;;  %s4846_s19 = inlined_call_operand.vmem [shape: f32[1,128], index: 19, kind: input, shape index: {}]   ;;  %s4847_s20 = inlined_call_operand.hbm [shape: f32[32,128], index: 20, kind: output, shape index: {}]  }
   0x1   :  { %4852 = sst [smem:[#allocation5_spill]] %s4827_s0 }
   0x2   :  { %4853 = sst [smem:[#allocation6_spill]] %s4828_s1 }
   0x3   :  { %4854 = sst [smem:[#allocation7_spill]] %s4829_s2 }
   0x4   :  { %4855 = sst [smem:[#allocation8_spill]] %s4830_s3 }
   0x5   :  { %4856 = sst [smem:[#allocation9_spill]] %s4831_s4 }
   0x6   :  { %s4857_s23 = sld [smem:[#allocation6_spill]]  ;;  %s4858_s29 = sld [smem:[#allocation5_spill]] }
   0xc   :  { %v3511_v0 = vld [vmem:[%s4857_s23] sm:$0xff]   ;;  %v3512_v1 = vld [vmem:[%s4857_s23 + $0x8] sm:$0xff]   ;;  %v3513_v2 = vld [vmem:[%s4857_s23 + $0x10] sm:$0xff]  }
   0xd   :  { %3171 = vmatprep.subr.bf16.mxu0 %v3511_v0  ;;  %v3514_v3 = vld [vmem:[%s4857_s23 + $0x18] sm:$0xff]   ;;  %v95_v4 = vld [vmem:[%s4858_s29] sm:$0xff]  ;;  %v96_v5 = vld [vmem:[%s4858_s29 + $0x8] sm:$0xff] }
   0xe   :  { %3172 = vmatpush3.bf16.msra.mxu0 %v3511_v0  ;;  %v99_v6 = vpack.c.bf16 %v96_v5, %v95_v4  ;;  %v3515_v7 = vld [vmem:[%s4857_s23 + $0x20] sm:$0xff]   ;;  %v3516_v8 = vld [vmem:[%s4857_s23 + $0x28] sm:$0xff]   ;;  %v3517_v9 = vld [vmem:[%s4857_s23 + $0x30] sm:$0xff]  }
   0xf   :  { %3173 = vmatprep.subr.bf16.mxu0 %v3512_v1  ;;  %v3518_v10 = vld [vmem:[%s4857_s23 + $0x38] sm:$0xff]   ;;  %v97_v11 = vld [vmem:[%s4858_s29 + $0x10] sm:$0xff] }
  0x10   :  { %3187 = vmatprep.mubr.bf16.mxu0 %v99_v6  ;;  %v98_v12 = vld [vmem:[%s4858_s29 + $0x18] sm:$0xff] }
  0x11   :  { %v100_v13 = vpack.c.bf16 %v98_v12, %v97_v11 }
  0x12   :  { %3174 = vmatpush3.bf16.msra.mxu0 %v3512_v1 }
  0x13   :  { %3175 = vmatprep.subr.bf16.mxu0 %v3513_v2 }
  0x16   :  { %3176 = vmatpush3.bf16.msra.mxu0 %v3513_v2 }
  0x17   :  { %3177 = vmatprep.subr.bf16.mxu0 %v3514_v3 }
  0x1a   :  { %3178 = vmatpush3.bf16.msra.mxu0 %v3514_v3 }
  0x1b   :  { %3179 = vmatprep.subr.bf16.mxu0 %v3515_v7 }
  0x1e   :  { %3180 = vmatpush3.bf16.msra.mxu0 %v3515_v7 }
  0x1f   :  { %3181 = vmatprep.subr.bf16.mxu0 %v3516_v8 }
  0x22   :  { %3182 = vmatpush3.bf16.msra.mxu0 %v3516_v8 }
  0x23   :  { %3183 = vmatprep.subr.bf16.mxu0 %v3517_v9 }
  0x26   :  { %3184 = vmatpush3.bf16.msra.mxu0 %v3517_v9 }
  0x27   :  { %3185 = vmatprep.subr.bf16.mxu0 %v3518_v10 }
  0x2a   :  { %3186 = vmatpush3.bf16.msra.mxu0 %v3518_v10 }
  0x2d   :  { %3188 = vmatmul.mubr.bf16.vlgmr.msra.gmra.mrb[0].mxu0 %v100_v13 }
  0x2e   :  { %25 = vsyncpa [#allocation3], 0  ;;  %s4859_s1 = sld [smem:[#allocation7_spill]]  ;;  %s4860_s24 = sld [smem:[#allocation8_spill]]  ;;  %v3519_v31 = vld [vmem:[%s4835_s8 + $0x4] ss:$12 sps:$4 sm:$0xff]  }
  0x2f   :  { %v3521_v32 = vld [vmem:[%s4835_s8] ss:$12 sps:$4 sm:$0xff]   ;;  %v3522_v33 = vld [vmem:[%s4835_s8 + $0x1c] ss:$12 sps:$4 sm:$0xff]   ;;  %475 = vmatprep.subr.bf16.mxu1 %v3519_v31  ;;  %v3525_v51 = vld [vmem:[%s4835_s8 + $0x18] ss:$12 sps:$4 sm:$0xff]  }
  0x30   :  { %v3524_v34 = vld [vmem:[%s4835_s8 + $0x8] ss:$12 sps:$4 sm:$0xff]   ;;  %476 = vmatpush1.bf16.msra.mxu1 %v3521_v32  ;;  %v3528_v53 = vld [vmem:[%s4835_s8 + $0x20] ss:$12 sps:$4 sm:$0xff]   ;;  %v3529_v54 = vld [vmem:[%s4835_s8 + $0x30] ss:$12 sps:$4 sm:$0xff]  }
  0x31   :  { %3191 = vmatprep.subr.bf16.mxu0 %v3524_v34  ;;  %477 = vmatprep.subr.bf16.mxu1 %v3522_v33  ;;  %v3526_v52 = vld [vmem:[%s4835_s8 + $0x34] ss:$12 sps:$4 sm:$0xff]   ;;  %v3530_v55 = vld [vmem:[%s4835_s8 + $0x4c] ss:$12 sps:$4 sm:$0xff]   ;;  %v3534_v58 = vld [vmem:[%s4835_s8 + $0x64] ss:$12 sps:$4 sm:$0xff]  }
  0x32   :  { %3192 = vmatpush3.bf16.msra.mxu0 %v3524_v34  ;;  %v3532_v56 = vld [vmem:[%s4835_s8 + $0x38] ss:$12 sps:$4 sm:$0xff]   ;;  %v3533_v57 = vld [vmem:[%s4835_s8 + $0x48] ss:$12 sps:$4 sm:$0xff]   ;;  %v3536_v59 = vld [vmem:[%s4835_s8 + $0x50] ss:$12 sps:$4 sm:$0xff]  }
  0x33   :  { %3193 = vmatprep.subr.bf16.mxu0 %v3528_v53  ;;  %v3537_v60 = vld [vmem:[%s4835_s8 + $0x60] ss:$12 sps:$4 sm:$0xff]   ;;  %v3538_v61 = vld [vmem:[%s4835_s8 + $0x7c] ss:$12 sps:$4 sm:$0xff]   ;;  %v3541_v63 = vld [vmem:[%s4835_s8 + $0x78] ss:$12 sps:$4 sm:$0xff]  }
  0x34   :  { %v2730_v14 = vld [vmem:[%s4859_s1] ss:$0 sm:$0xff]  ;;  %v223_v16 = vld [vmem:[%s4860_s24 + $0x10] sm:$0xff]  ;;  %v224_v26 = vld [vmem:[%s4860_s24 + $0x18] sm:$0xff]  ;;  %478 = vmatpush1.bf16.msra.mxu1 %v3525_v51  ;;  %v3811_v6 = vmov 0   ;;  %s4861_s3 = sld [smem:[#allocation9_spill]] }
  0x35   :  { %v221_v19 = vld [vmem:[%s4860_s24] sm:$0xff]  ;;  %v222_v28 = vld [vmem:[%s4860_s24 + $0x8] sm:$0xff]  ;;  %479 = vmatprep.subr.bf16.mxu1 %v3526_v52  ;;  %v3545_v2 = vld [vmem:[%s4835_s8 + $0x90] ss:$12 sps:$4 sm:$0xff]   ;;  %507 = vmatprep.mubr.bf16.mxu1 %v3811_v6 }
  0x36   :  { %3194 = vmatpush3.bf16.msra.mxu0 %v3528_v53  ;;  %v3540_v62 = vld [vmem:[%s4835_s8 + $0x68] ss:$12 sps:$4 sm:$0xff]   ;;  %v3544_v1 = vld [vmem:[%s4835_s8 + $0x80] ss:$12 sps:$4 sm:$0xff]   ;;  %v3548_v4 = vld [vmem:[%s4835_s8 + $0x98] ss:$12 sps:$4 sm:$0xff]  }
  0x37   :  { %3195 = vmatprep.subr.bf16.mxu0 %v3532_v56  ;;  %v3542_v0 = vld [vmem:[%s4835_s8 + $0x94] ss:$12 sps:$4 sm:$0xff]   ;;  %v3546_v3 = vld [vmem:[%s4835_s8 + $0xac] ss:$12 sps:$4 sm:$0xff]   ;;  %v3550_v7 = vld [vmem:[%s4835_s8 + $0xb0] ss:$12 sps:$4 sm:$0xff]  }
  0x38   :  { %480 = vmatpush1.bf16.msra.mxu1 %v3529_v54  ;;  %v3549_v5 = vld [vmem:[%s4835_s8 + $0xa8] ss:$12 sps:$4 sm:$0xff]   ;;  %v71_v8 = vld [vmem:[%s4832_s5] sm:$0xff]  ;;  %v78_v54 = vld [vmem:[%s4832_s5 + $0x38] sm:$0xff] }
  0x39   :  { %481 = vmatprep.subr.bf16.mxu1 %v3530_v55  ;;  %v72_v9 = vld [vmem:[%s4832_s5 + $0x8] sm:$0xff]  ;;  %v77_v53 = vld [vmem:[%s4832_s5 + $0x30] sm:$0xff] }
  0x3a   :  { %3196 = vmatpush3.bf16.msra.mxu0 %v3532_v56  ;;  %v4082_v10 = vpack.c.bf16 %v72_v9, %v71_v8  ;;  %v76_v51 = vld [vmem:[%s4832_s5 + $0x28] sm:$0xff]  ;;  %v4122_v55 = vpack.c.bf16 %v78_v54, %v77_v53  ;;  %v79_v56 = vld [vmem:[%s4832_s5 + $0x40] sm:$0xff] }
  0x3b   :  { %3197 = vmatprep.subr.bf16.mxu0 %v3536_v59  ;;  %v330_v8 = vld [vmem:[%s4836_s9] sm:$0x7] }
  0x3c   :  { %482 = vmatpush1.bf16.msra.mxu1 %v3533_v57  ;;  %v80_v57 = vld [vmem:[%s4832_s5 + $0x48] sm:$0xff] }
  0x3d   :  { %483 = vmatprep.subr.bf16.mxu1 %v3534_v58  ;;  %v4133_v58 = vpack.c.bf16 %v80_v57, %v79_v56 }
  0x3e   :  { %3198 = vmatpush3.bf16.msra.mxu0 %v3536_v59  ;;  %v81_v59 = vld [vmem:[%s4832_s5 + $0x50] sm:$0xff] }
  0x3f   :  { %3199 = vmatprep.subr.bf16.mxu0 %v3540_v62 }
  0x40   :  { %484 = vmatpush1.bf16.msra.mxu1 %v3537_v60  ;;  %v82_v60 = vld [vmem:[%s4832_s5 + $0x58] sm:$0xff] }
  0x41   :  { %485 = vmatprep.subr.bf16.mxu1 %v3538_v61  ;;  %v4143_v61 = vpack.c.bf16 %v82_v60, %v81_v59 }
  0x42   :  { %3200 = vmatpush3.bf16.msra.mxu0 %v3540_v62  ;;  %v83_v62 = vld [vmem:[%s4832_s5 + $0x60] sm:$0xff] }
  0x43   :  { %3201 = vmatprep.subr.bf16.mxu0 %v3544_v1 }
  0x44   :  { %486 = vmatpush1.bf16.msra.mxu1 %v3541_v63  ;;  %v84_v63 = vld [vmem:[%s4832_s5 + $0x68] sm:$0xff] }
  0x45   :  { %487 = vmatprep.subr.bf16.mxu1 %v3542_v0  ;;  %v4153_v0 = vpack.c.bf16 %v84_v63, %v83_v62  ;;  %v67_v63 = vld [vmem:[%s4861_s3] sm:$0xff] }
  0x46   :  { %3202 = vmatpush3.bf16.msra.mxu0 %v3544_v1  ;;  %v85_v1 = vld [vmem:[%s4832_s5 + $0x70] sm:$0xff] }
  0x47   :  { %3203 = vmatprep.subr.bf16.mxu0 %v3548_v4 }
  0x48   :  { %488 = vmatpush1.bf16.msra.mxu1 %v3545_v2  ;;  %v86_v2 = vld [vmem:[%s4832_s5 + $0x78] sm:$0xff] }
  0x49   :  { %489 = vmatprep.subr.bf16.mxu1 %v3546_v3  ;;  %v4163_v3 = vpack.c.bf16 %v86_v2, %v85_v1 }
  0x4a   :  { %3204 = vmatpush3.bf16.msra.mxu0 %v3548_v4  ;;  %v332_v4 = vlaneseq }
  0x4b   :  { %3205 = vmatprep.subr.bf16.mxu0 %v3550_v7 }
  0x4c   :  { %490 = vmatpush1.bf16.msra.mxu1 %v3549_v5  ;;  %v4167_v5 = vshrl.u32 %v332_v4, 7  ;;  %v68_v4 = vld [vmem:[%s4861_s3 + $0x8] sm:$0xff] }
  0x4e   :  { %3206 = vmatpush3.bf16.msra.mxu0 %v3550_v7  ;;  %v4170_v7 = vsub.s32 0, %v4167_v5  ;;  %v4176_v9 = vsub.s32 1, %v4167_v5 }
  0x4f   :  { %3428 = vmatprep.subr.bf16.mxu0 %v4082_v10 }
 0x100   :  { %v3189_v15 = vpop.f32.mrb[0].mxu0 }
 0x101   :  { %v215_v17 = vadd.f32 %v3189_v15, %v2730_v14  ;;  %v206_v18 = vpop.f32.mrb[1].mxu0 }
 0x102   :  { %v207_v20 = vadd.f32 %v2730_v14, %v206_v18  ;;  %v3190_v21 = vpop.f32.mrb[2].mxu0 }
 0x103   :  { %v3965_v22 = vadd.f32 %v223_v16, %v215_v17  ;;  %v218_v23 = vadd.f32 %v3190_v21, %v2730_v14  ;;  %v209_v24 = vpop.f32.mrb[3].mxu0 }
 0x104   :  { %v3967_v25 = vadd.f32 %v221_v19, %v207_v20  ;;  %v210_v27 = vadd.f32 %v2730_v14, %v209_v24 }
 0x105   :  { %235 = vadd.xlane.f32.xlu1 %v3965_v22  ;;  %v3977_v29 = vadd.f32 %v224_v26, %v218_v23 }
 0x106   :  { %231 = vadd.xlane.f32.xlu0 %v3967_v25  ;;  %v3979_v30 = vadd.f32 %v222_v28, %v210_v27  ;;  %v2739_v27 = vld [vmem:[%s4833_s6] ss:$0 sm:$0xff] }
 0x109   :  { %237 = vadd.xlane.f32.xlu1 %v3977_v29 }
 0x10a   :  { %233 = vadd.xlane.f32.xlu0 %v3979_v30 }
 0x192   :  { %v236_v35 = vpop.xlane.xlu1 %235 }
 0x193   :  { %v232_v36 = vpop.xlane.xlu0 %231  ;;  %v242_v37 = vmul.f32 0.0078125, %v236_v35  ;;  %v2740_v35 = vld [vmem:[%s4834_s7] ss:$0 sm:$0xff] }
 0x194   :  { %v240_v38 = vmul.f32 0.0078125, %v232_v36 }
 0x195   :  { %v3999_v42 = vsub.f32 %v3965_v22, %v242_v37 }
 0x196   :  { %v3996_v39 = vsub.f32 %v3967_v25, %v240_v38  ;;  %v238_v40 = vpop.xlane.xlu1 %237 }
 0x197   :  { %v234_v41 = vpop.xlane.xlu0 %233  ;;  %v243_v43 = vmul.f32 0.0078125, %v238_v40  ;;  %v250_v48 = vmul.f32 %v3999_v42, %v3999_v42 }
 0x198   :  { %v241_v44 = vmul.f32 0.0078125, %v234_v41  ;;  %v248_v45 = vmul.f32 %v3996_v39, %v3996_v39 }
 0x199   :  { %v4007_v47 = vsub.f32 %v3977_v29, %v243_v43 }
 0x19a   :  { %v4004_v46 = vsub.f32 %v3979_v30, %v241_v44  ;;  %252 = vadd.xlane.f32.xlu0 %v248_v45  ;;  %v73_v45 = vld [vmem:[%s4832_s5 + $0x10] sm:$0xff] }
 0x19b   :  { %v251_v50 = vmul.f32 %v4007_v47, %v4007_v47 }
 0x19c   :  { %v249_v49 = vmul.f32 %v4004_v46, %v4004_v46 }
 0x19e   :  { %256 = vadd.xlane.f32.xlu0 %v250_v48  ;;  %254 = vadd.xlane.f32.xlu1 %v249_v49 }
 0x1a2   :  { %258 = vadd.xlane.f32.xlu1 %v251_v50  ;;  %v75_v50 = vld [vmem:[%s4832_s5 + $0x20] sm:$0xff] }
 0x1a3   :  { %v4112_v52 = vpack.c.bf16 %v76_v51, %v75_v50 }
 0x227   :  { %v253_v11 = vpop.xlane.xlu0 %252 }
 0x228   :  { %v260_v12 = vmul.f32 0.0078125, %v253_v11  ;;  %v342_v11 = vsub.s32 2, %v4167_v5 }
 0x22a   :  { %v264_v13 = vadd.f32 1e-06, %v260_v12  ;;  %v335_v12 = vrot.slane %v330_v8, %v4170_v7 }
 0x22b   :  { %v255_v14 = vpop.xlane.xlu1 %254  ;;  %v257_v15 = vpop.xlane.xlu0 %256 }
 0x22c   :  { %3679 = vrsqrt.f32 %v264_v13  ;;  %v261_v16 = vmul.f32 0.0078125, %v255_v14  ;;  %v262_v17 = vmul.f32 0.0078125, %v257_v15  ;;  %v339_v14 = vrot.slane %v330_v8, %v4176_v9 }
 0x22e   :  { %v265_v18 = vadd.f32 1e-06, %v261_v16  ;;  %v266_v19 = vadd.f32 1e-06, %v262_v17  ;;  %v343_v16 = vrot.slane %v330_v8, %v342_v11 }
 0x22f   :  { %v259_v20 = vpop.xlane.xlu1 %258 }
 0x230   :  { %3681 = vrsqrt.f32 %v265_v18  ;;  %v263_v21 = vmul.f32 0.0078125, %v259_v20 }
 0x231   :  { %3683 = vrsqrt.f32 %v266_v19 }
 0x232   :  { %v267_v23 = vadd.f32 1e-06, %v263_v21 }
 0x234   :  { %3685 = vrsqrt.f32 %v267_v23 }
 0x236   :  { %v3680_v24 = vpop.eup %3679 }
 0x237   :  { %v272_v26 = vmul.f32 %v3680_v24, %v3996_v39 }
 0x239   :  { %v282_v33 = vmul.f32 %v2739_v27, %v272_v26 }
 0x23a   :  { %v3682_v28 = vpop.eup %3681 }
 0x23b   :  { %v3684_v31 = vpop.eup %3683  ;;  %v273_v32 = vmul.f32 %v3682_v28, %v4004_v46  ;;  %v292_v39 = vadd.f32 %v2740_v35, %v282_v33 }
 0x23c   :  { %v274_v34 = vmul.f32 %v3684_v31, %v3999_v42  ;;  %v74_v42 = vld [vmem:[%s4832_s5 + $0x18] sm:$0xff] }
 0x23d   :  { %v283_v36 = vmul.f32 %v2739_v27, %v273_v32  ;;  %v4102_v49 = vpack.c.bf16 %v74_v42, %v73_v45 }
 0x23e   :  { %v3686_v37 = vpop.eup %3685  ;;  %v284_v41 = vmul.f32 %v2739_v27, %v274_v34 }
 0x23f   :  { %v275_v38 = vmul.f32 %v3686_v37, %v4007_v47  ;;  %v293_v40 = vadd.f32 %v2740_v35, %v283_v36 }
 0x240   :  { %v294_v46 = vadd.f32 %v2740_v35, %v284_v41 }
 0x241   :  { %v296_v43 = vpack.c.bf16 %v293_v40, %v292_v39  ;;  %v285_v44 = vmul.f32 %v2739_v27, %v275_v38 }
 0x243   :  { %508 = vmatmul.mubr.bf16.vlgmr.msra.gmra.mrb[0].mxu1 %v296_v43  ;;  %3207 = vmatprep.mubr.bf16.mxu0 %v296_v43  ;;  %v295_v48 = vadd.f32 %v2740_v35, %v285_v44 }
 0x244   :  { %517 = vmatprep.mubr.bf16.mxu1 %v3811_v6 }
 0x245   :  { %v297_v47 = vpack.c.bf16 %v295_v48, %v294_v46 }
 0x247   :  { %3208 = vmatmul.mubr.bf16.vlgmr.msra.gmra.mrb[4].mxu0 %v297_v47 }
 0x248   :  { %3430 = vmatpush3.bf16.msra.mxu0 %v4082_v10 }
 0x249   :  { %3432 = vmatprep.subr.bf16.mxu0 %v4102_v49 }
 0x24b   :  { %518 = vmatmul.mubr.bf16.gmra.mrb[4].mxu1 %v297_v47 }
 0x24c   :  { %3434 = vmatpush3.bf16.msra.mxu0 %v4102_v49 }
 0x24d   :  { %3436 = vmatprep.subr.bf16.mxu0 %v4112_v52 }
 0x250   :  { %3438 = vmatpush3.bf16.msra.mxu0 %v4112_v52 }
 0x251   :  { %3440 = vmatprep.subr.bf16.mxu0 %v4122_v55 }
 0x254   :  { %3442 = vmatpush3.bf16.msra.mxu0 %v4122_v55 }
 0x255   :  { %3444 = vmatprep.subr.bf16.mxu0 %v4133_v58 }
 0x258   :  { %3446 = vmatpush3.bf16.msra.mxu0 %v4133_v58 }
 0x259   :  { %3448 = vmatprep.subr.bf16.mxu0 %v4143_v61 }
 0x25c   :  { %3450 = vmatpush3.bf16.msra.mxu0 %v4143_v61 }
 0x25d   :  { %3452 = vmatprep.subr.bf16.mxu0 %v4153_v0 }
 0x260   :  { %3454 = vmatpush3.bf16.msra.mxu0 %v4153_v0 }
 0x261   :  { %3456 = vmatprep.subr.bf16.mxu0 %v4163_v3 }
 0x264   :  { %3458 = vmatpush3.bf16.msra.mxu0 %v4163_v3 }
 0x316   :  { %v509_v13 = vpop.f32.mrb[0].mxu1 }
 0x317   :  { %v511_v15 = vpop.f32.mrb[1].mxu1  ;;  %v510_v18 = vadd.f32 %v509_v13, %v335_v12  ;;  %v69_v13 = vld [vmem:[%s4861_s3 + $0x10] sm:$0xff] }
 0x318   :  { %v513_v17 = vpop.f32.mrb[2].mxu1  ;;  %v512_v21 = vadd.f32 %v511_v15, %v339_v14 }
 0x319   :  { %v514_v19 = vadd.f32 %v513_v17, %v335_v12  ;;  %v515_v20 = vpop.f32.mrb[3].mxu1 }
 0x31a   :  { %v516_v23 = vadd.f32 %v515_v20, %v339_v14  ;;  %v3209_v24 = vpop.f32.mrb[4].mxu0 }
 0x31b   :  { %v577_v26 = vpack.c.bf16 %v514_v19, %v510_v18  ;;  %v571_v27 = vadd.f32 %v3209_v24, %v343_v16  ;;  %v562_v28 = vpop.f32.mrb[5].mxu0 }
 0x31c   :  { %v579_v31 = vpack.c.bf16 %v516_v23, %v512_v21  ;;  %v3210_v32 = vpop.f32.mrb[6].mxu0  ;;  %v563_v35 = vadd.f32 %v562_v28, %v343_v16 }
 0x31d   :  { %v574_v33 = vadd.f32 %v3210_v32, %v343_v16  ;;  %v565_v34 = vpop.f32.mrb[7].mxu0  ;;  %3227 = vmatprep.mubr.bf16.mxu1 %v577_v26 }
 0x31e   :  { %v566_v36 = vadd.f32 %v565_v34, %v343_v16  ;;  %v519_v37 = vpop.f32.mrb[4].mxu1  ;;  %v583_v38 = vmul.bf16 %v579_v31, %v4082_v10  ;;  %v585_v54 = vmul.bf16 %v579_v31, %v4112_v52  ;;  %v587_v57 = vmul.bf16 %v579_v31, %v4133_v58  ;;  %v70_v16 = vld [vmem:[%s4861_s3 + $0x18] sm:$0xff] }
 0x31f   :  { %v4184_v39 = vpack.c.bf16 %v574_v33, %v571_v27  ;;  %v520_v40 = vadd.f32 %v519_v37, %v335_v12  ;;  %v521_v41 = vpop.f32.mrb[5].mxu1  ;;  %v589_v60 = vmul.bf16 %v579_v31, %v4153_v0 }
 0x320   :  { %v4186_v43 = vpack.c.bf16 %v566_v36, %v563_v35  ;;  %v523_v44 = vpop.f32.mrb[6].mxu1  ;;  %3211 = vmatprep.subr.bf16.mxu1 %v583_v38  ;;  %v522_v46 = vadd.f32 %v521_v41, %v339_v14 }
 0x321   :  { %v524_v45 = vadd.f32 %v523_v44, %v335_v12  ;;  %v525_v42 = vpop.f32.mrb[7].mxu1  ;;  %3212 = vmatpush3.bf16.xpose.msra.mxu1 %v583_v38  ;;  %v592_v37 = vmul.bf16 %v4184_v39, %v4102_v49  ;;  %v594_v44 = vmul.bf16 %v4184_v39, %v4122_v55 }
 0x322   :  { %v526_v48 = vadd.f32 %v525_v42, %v339_v14  ;;  %v4190_v47 = vmul.bf16 %v4186_v43, %v4082_v10  ;;  %v593_v41 = vmul.bf16 %v4186_v43, %v4112_v52  ;;  %v596_v42 = vmul.bf16 %v4184_v39, %v4143_v61 }
 0x323   :  { %v578_v50 = vpack.c.bf16 %v524_v45, %v520_v40  ;;  %v595_v45 = vmul.bf16 %v4186_v43, %v4133_v58 }
 0x324   :  { %v580_v51 = vpack.c.bf16 %v526_v48, %v522_v46  ;;  %3269 = vmatprep.subr.bf16.mxu0 %v4190_v47  ;;  %v597_v46 = vmul.bf16 %v4186_v43, %v4153_v0  ;;  %v598_v48 = vmul.bf16 %v4184_v39, %v4163_v3  ;;  %v3553_v43 = vld [vmem:[%s4837_s10 + $0x10] sm:$0xff]   ;;  %v3554_v39 = vld [vmem:[%s4837_s10 + $0x18] sm:$0xff]  }
 0x326   :  { %v584_v53 = vmul.bf16 %v580_v51, %v4102_v49  ;;  %v586_v56 = vmul.bf16 %v580_v51, %v4122_v55  ;;  %v588_v59 = vmul.bf16 %v580_v51, %v4143_v61  ;;  %v590_v62 = vmul.bf16 %v580_v51, %v4163_v3  ;;  %v3555_v51 = vld [vmem:[%s4837_s10 + $0x20] sm:$0xff]  }
 0x328   :  { %3213 = vmatprep.subr.bf16.mxu1 %v584_v53 }
 0x329   :  { %3214 = vmatpush3.bf16.xpose.msra.mxu1 %v584_v53  ;;  %v3556_v53 = vld [vmem:[%s4837_s10 + $0x28] sm:$0xff]  }
 0x32a   :  { %3215 = vmatprep.subr.bf16.mxu1 %v585_v54 }
 0x331   :  { %3216 = vmatpush3.bf16.xpose.msra.mxu1 %v585_v54  ;;  %v3557_v54 = vld [vmem:[%s4837_s10 + $0x30] sm:$0xff]  }
 0x332   :  { %3217 = vmatprep.subr.bf16.mxu1 %v586_v56 }
 0x339   :  { %3218 = vmatpush3.bf16.xpose.msra.mxu1 %v586_v56 }
 0x33a   :  { %3219 = vmatprep.subr.bf16.mxu1 %v587_v57 }
 0x341   :  { %3220 = vmatpush3.bf16.xpose.msra.mxu1 %v587_v57 }
 0x342   :  { %3221 = vmatprep.subr.bf16.mxu1 %v588_v59 }
 0x349   :  { %3222 = vmatpush3.bf16.xpose.msra.mxu1 %v588_v59 }
 0x34a   :  { %3223 = vmatprep.subr.bf16.mxu1 %v589_v60 }
 0x351   :  { %3224 = vmatpush3.bf16.xpose.msra.mxu1 %v589_v60 }
 0x352   :  { %3225 = vmatprep.subr.bf16.mxu1 %v590_v62 }
 0x359   :  { %3226 = vmatpush3.bf16.xpose.msra.mxu1 %v590_v62 }
 0x360   :  { %3228 = vmatmul.mubr.bf16.vlgmr.msra.gmra.mrb[8].mxu1 %v578_v50  ;;  %v3552_v50 = vld [vmem:[%s4837_s10 + $0x8] sm:$0xff]  }
 0x433   :  { %v3229_v1 = vpop.f32.mrb[8].mxu1 }
 0x434   :  { %v633_v2 = vpop.f32.mrb[9].mxu1  ;;  %v642_v17 = vadd.f32 %v3229_v1, %v69_v13 }
 0x435   :  { %v634_v8 = vadd.f32 %v633_v2, %v67_v63  ;;  %v3230_v12 = vpop.f32.mrb[10].mxu1 }
 0x436   :  { %v636_v14 = vpop.f32.mrb[11].mxu1  ;;  %v645_v18 = vadd.f32 %v3230_v12, %v70_v16  ;;  %v3558_v16 = vld [vmem:[%s4837_s10 + $0x38] sm:$0xff]  }
 0x437   :  { %v637_v15 = vadd.f32 %v636_v14, %v68_v4  ;;  %648 = vmax.xlane.f32.xlu0 %v634_v8 }
 0x439   :  { %650 = vmax.xlane.f32.xlu1 %v637_v15 }
 0x43b   :  { %652 = vmax.xlane.f32.xlu0 %v642_v17 }
 0x43d   :  { %654 = vmax.xlane.f32.xlu1 %v645_v18 }
 0x4c4   :  { %v649_v19 = vpop.xlane.xlu0 %648 }
 0x4c5   :  { %v656_v20 = vsub.f32 %v634_v8, %v649_v19 }
 0x4c6   :  { %v651_v21 = vpop.xlane.xlu1 %650 }
 0x4c7   :  { %v660_v23 = vmul.f32 1.442695, %v656_v20  ;;  %v657_v24 = vsub.f32 %v637_v15, %v651_v21 }
 0x4c8   :  { %v653_v26 = vpop.xlane.xlu0 %652 }
 0x4c9   :  { %3687 = vpow2.f32 %v660_v23  ;;  %v662_v27 = vmul.f32 1.442695, %v657_v24  ;;  %v658_v28 = vsub.f32 %v642_v17, %v653_v26  ;;  %v2765_v24 = vld [vmem:[%s4838_s11] ss:$0 sm:$0xff] }
 0x4ca   :  { %v655_v31 = vpop.xlane.xlu1 %654 }
 0x4cb   :  { %3689 = vpow2.f32 %v662_v27  ;;  %v664_v32 = vmul.f32 1.442695, %v658_v28  ;;  %v659_v33 = vsub.f32 %v645_v18, %v655_v31 }
 0x4cd   :  { %3691 = vpow2.f32 %v664_v32  ;;  %v666_v34 = vmul.f32 1.442695, %v659_v33 }
 0x4cf   :  { %3693 = vpow2.f32 %v666_v34 }
 0x4d3   :  { %v3688_v35 = vpop.eup %3687 }
 0x4d4   :  { %3263 = vmatprep.mubr.f32.mxu0 %v3688_v35 }
 0x4d5   :  { %v3690_v36 = vpop.eup %3689 }
 0x4d6   :  { %3264 = vmatmul.mubr.f32.vlgmr.msra.gmra.mrb[8].mxu0 %v3690_v36 }
 0x4d7   :  { %v3692_v38 = vpop.eup %3691  ;;  %3270 = vmatpush3.bf16.msra.mxu0 %v4190_v47  ;;  %v3551_v47 = vld [vmem:[%s4837_s10] sm:$0xff]  }
 0x4d8   :  { %3271 = vmatprep.subr.bf16.mxu0 %v592_v37  ;;  %3266 = vmatprep.mubr.f32.mxu0 %v3692_v38 }
 0x4d9   :  { %v3694_v40 = vpop.eup %3693  ;;  %3289 = vmatprep.subr.bf16.mxu1 %v3551_v47 }
 0x4da   :  { %3267 = vmatmul.mubr.f32.gmra.mrb[10].mxu0 %v3694_v40  ;;  %3290 = vmatpush3.bf16.msra.mxu1 %v3551_v47 }
 0x4db   :  { %3272 = vmatpush3.bf16.msra.mxu0 %v592_v37  ;;  %3291 = vmatprep.subr.bf16.mxu1 %v3552_v50 }
 0x4dc   :  { %3273 = vmatprep.subr.bf16.mxu0 %v593_v41 }
 0x4de   :  { %3292 = vmatpush3.bf16.msra.mxu1 %v3552_v50 }
 0x4df   :  { %3274 = vmatpush3.bf16.msra.mxu0 %v593_v41  ;;  %3293 = vmatprep.subr.bf16.mxu1 %v3553_v43 }
 0x4e0   :  { %3275 = vmatprep.subr.bf16.mxu0 %v594_v44 }
 0x4e2   :  { %3294 = vmatpush3.bf16.msra.mxu1 %v3553_v43 }
 0x4e3   :  { %3276 = vmatpush3.bf16.msra.mxu0 %v594_v44  ;;  %3295 = vmatprep.subr.bf16.mxu1 %v3554_v39 }
 0x4e4   :  { %3277 = vmatprep.subr.bf16.mxu0 %v595_v45 }
 0x4e6   :  { %3296 = vmatpush3.bf16.msra.mxu1 %v3554_v39 }
 0x4e7   :  { %3278 = vmatpush3.bf16.msra.mxu0 %v595_v45  ;;  %3297 = vmatprep.subr.bf16.mxu1 %v3555_v51 }
 0x4e8   :  { %3279 = vmatprep.subr.bf16.mxu0 %v596_v42 }
 0x4ea   :  { %3298 = vmatpush3.bf16.msra.mxu1 %v3555_v51 }
 0x4eb   :  { %3280 = vmatpush3.bf16.msra.mxu0 %v596_v42  ;;  %3299 = vmatprep.subr.bf16.mxu1 %v3556_v53 }
 0x4ec   :  { %3281 = vmatprep.subr.bf16.mxu0 %v597_v46 }
 0x4ee   :  { %3300 = vmatpush3.bf16.msra.mxu1 %v3556_v53 }
 0x4ef   :  { %3282 = vmatpush3.bf16.msra.mxu0 %v597_v46  ;;  %3301 = vmatprep.subr.bf16.mxu1 %v3557_v54 }
 0x4f0   :  { %3283 = vmatprep.subr.bf16.mxu0 %v598_v48 }
 0x4f2   :  { %3302 = vmatpush3.bf16.msra.mxu1 %v3557_v54 }
 0x4f3   :  { %3284 = vmatpush3.bf16.msra.mxu0 %v598_v48  ;;  %3303 = vmatprep.subr.bf16.mxu1 %v3558_v16 }
 0x4f6   :  { %3304 = vmatpush3.bf16.msra.mxu1 %v3558_v16  ;;  %v3580_v16 = vld [vmem:[%s4841_s14 + $0x70] ss:$8 sps:$4 sm:$0xff]  }
 0x5a9   :  { %v3265_v56 = vpop.f32.mrb[8].mxu0 }
 0x5aa   :  { %3695 = vrcp.f32 %v3265_v56  ;;  %v734_v57 = vpop.f32.mrb[9].mxu0 }
 0x5ab   :  { %3697 = vrcp.f32 %v734_v57 }
 0x5ad   :  { %v3268_v59 = vpop.f32.mrb[10].mxu0 }
 0x5ae   :  { %3699 = vrcp.f32 %v3268_v59  ;;  %v744_v60 = vpop.f32.mrb[11].mxu0 }
 0x5af   :  { %3701 = vrcp.f32 %v744_v60  ;;  %v3567_v60 = vld [vmem:[%s4841_s14 + $0x24] ss:$8 sps:$4 sm:$0xff]  }
 0x5b4   :  { %v3696_v62 = vpop.eup %3695 }
 0x5b5   :  { %v3698_v63 = vpop.eup %3697  ;;  %v758_v1 = vmul.f32 %v3696_v62, %v3690_v36  ;;  %v3565_v62 = vld [vmem:[%s4841_s14 + $0x20] ss:$8 sps:$4 sm:$0xff]  }
 0x5b6   :  { %v757_v2 = vmul.f32 %v3698_v63, %v3688_v35  ;;  %v3570_v63 = vld [vmem:[%s4841_s14 + $0x34] ss:$8 sps:$4 sm:$0xff]  }
 0x5b8   :  { %v3700_v4 = vpop.eup %3699  ;;  %v761_v8 = vpack.c.bf16 %v758_v1, %v757_v2  ;;  %v3568_v1 = vld [vmem:[%s4841_s14 + $0x30] ss:$8 sps:$4 sm:$0xff]   ;;  %v3573_v2 = vld [vmem:[%s4841_s14 + $0x44] ss:$8 sps:$4 sm:$0xff]  }
 0x5b9   :  { %v3702_v12 = vpop.eup %3701  ;;  %v760_v13 = vmul.f32 %v3700_v4, %v3694_v40  ;;  %v3571_v4 = vld [vmem:[%s4841_s14 + $0x40] ss:$8 sps:$4 sm:$0xff]  }
 0x5ba   :  { %v759_v14 = vmul.f32 %v3702_v12, %v3692_v38  ;;  %3285 = vmatprep.mubr.bf16.mxu0 %v761_v8  ;;  %v3576_v8 = vld [vmem:[%s4841_s14 + $0x54] ss:$8 sps:$4 sm:$0xff]   ;;  %v3574_v12 = vld [vmem:[%s4841_s14 + $0x50] ss:$8 sps:$4 sm:$0xff]  }
 0x5bc   :  { %v762_v15 = vpack.c.bf16 %v760_v13, %v759_v14  ;;  %v3577_v13 = vld [vmem:[%s4841_s14 + $0x60] ss:$8 sps:$4 sm:$0xff]   ;;  %v3579_v14 = vld [vmem:[%s4841_s14 + $0x64] ss:$8 sps:$4 sm:$0xff]  }
 0x5be   :  { %3286 = vmatmul.mubr.bf16.vlgmr.msra.gmra.mrb[12].mxu0 %v762_v15  ;;  %v3582_v15 = vld [vmem:[%s4841_s14 + $0x74] ss:$8 sps:$4 sm:$0xff]  }
 0x5bf   :  { %1146 = vmatprep.mubr.bf16.mxu0 %v3811_v6 }
 0x691   :  { %v3287_v17 = vpop.f32.mrb[12].mxu0 }
 0x692   :  { %v797_v18 = vpop.f32.mrb[13].mxu0 }
 0x693   :  { %v3288_v19 = vpop.f32.mrb[14].mxu0 }
 0x694   :  { %v813_v20 = vpack.c.bf16 %v3288_v19, %v3287_v17  ;;  %v800_v21 = vpop.f32.mrb[15].mxu0 }
 0x695   :  { %v812_v23 = vpack.c.bf16 %v800_v21, %v797_v18 }
 0x697   :  { %3305 = vmatprep.mubr.bf16.mxu1 %v812_v23 }
 0x698   :  { %3306 = vmatmul.mubr.bf16.vlgmr.msra.gmra.mrb[12].mxu1 %v813_v20 }
 0x76b   :  { %v3307_v26 = vpop.f32.mrb[12].mxu1 }
 0x76c   :  { %v919_v27 = vpop.f32.mrb[13].mxu1  ;;  %v928_v33 = vadd.f32 %v3307_v26, %v2765_v24 }
 0x76d   :  { %v920_v28 = vadd.f32 %v2765_v24, %v919_v27  ;;  %v3308_v31 = vpop.f32.mrb[14].mxu1 }
 0x76e   :  { %v922_v32 = vpop.f32.mrb[15].mxu1  ;;  %v931_v36 = vadd.f32 %v3308_v31, %v2765_v24  ;;  %v4263_v38 = vadd.f32 %v928_v33, %v3965_v22  ;;  %v3564_v22 = vld [vmem:[%s4841_s14 + $0x14] ss:$8 sps:$4 sm:$0xff]  }
 0x76f   :  { %v4256_v34 = vadd.f32 %v920_v28, %v3967_v25  ;;  %v923_v35 = vadd.f32 %v2765_v24, %v922_v32  ;;  %v3559_v25 = vld [vmem:[%s4841_s14] ss:$8 sps:$4 sm:$0xff]  }
 0x770   :  { %v4267_v40 = vadd.f32 %v931_v36, %v3977_v29  ;;  %v3562_v29 = vld [vmem:[%s4841_s14 + $0x10] ss:$8 sps:$4 sm:$0xff]  }
 0x771   :  { %v4259_v37 = vadd.f32 %v923_v35, %v3979_v30  ;;  %940 = vadd.xlane.f32.xlu0 %v4256_v34  ;;  %v3561_v30 = vld [vmem:[%s4841_s14 + $0x4] ss:$8 sps:$4 sm:$0xff]   ;;  %v2774_v35 = vld [vmem:[%s4839_s12] ss:$0 sm:$0xff] }
 0x772   :  { %1114 = vmatprep.subr.bf16.mxu0 %v3561_v30 }
 0x773   :  { %942 = vadd.xlane.f32.xlu1 %v4259_v37  ;;  %1115 = vmatpush1.bf16.msra.mxu0 %v3559_v25 }
 0x774   :  { %1116 = vmatprep.subr.bf16.mxu0 %v3564_v22 }
 0x775   :  { %944 = vadd.xlane.f32.xlu0 %v4263_v38 }
 0x777   :  { %946 = vadd.xlane.f32.xlu1 %v4267_v40  ;;  %1117 = vmatpush1.bf16.msra.mxu0 %v3562_v29 }
 0x778   :  { %1118 = vmatprep.subr.bf16.mxu0 %v3567_v60  ;;  %v3586_v60 = vld [vmem:[%s4843_s16 + $0x8] sm:$0xff]  }
 0x77b   :  { %1119 = vmatpush1.bf16.msra.mxu0 %v3565_v62  ;;  %v3587_v62 = vld [vmem:[%s4843_s16 + $0x50] sm:$0xff]  }
 0x77c   :  { %1120 = vmatprep.subr.bf16.mxu0 %v3570_v63  ;;  %v3588_v63 = vld [vmem:[%s4843_s16 + $0x10] sm:$0xff]  }
 0x77f   :  { %1121 = vmatpush1.bf16.msra.mxu0 %v3568_v1  ;;  %v3589_v1 = vld [vmem:[%s4843_s16 + $0x58] sm:$0xff]  }
 0x780   :  { %1122 = vmatprep.subr.bf16.mxu0 %v3573_v2  ;;  %v3590_v2 = vld [vmem:[%s4843_s16 + $0x18] sm:$0xff]  }
 0x783   :  { %1123 = vmatpush1.bf16.msra.mxu0 %v3571_v4  ;;  %v3591_v4 = vld [vmem:[%s4843_s16 + $0x60] sm:$0xff]  }
 0x784   :  { %1124 = vmatprep.subr.bf16.mxu0 %v3576_v8  ;;  %v3592_v8 = vld [vmem:[%s4843_s16 + $0x20] sm:$0xff]  }
 0x787   :  { %1125 = vmatpush1.bf16.msra.mxu0 %v3574_v12  ;;  %v3593_v12 = vld [vmem:[%s4843_s16 + $0x68] sm:$0xff]  }
 0x788   :  { %1126 = vmatprep.subr.bf16.mxu0 %v3579_v14  ;;  %v3595_v14 = vld [vmem:[%s4843_s16 + $0x70] sm:$0xff]  }
 0x78b   :  { %1127 = vmatpush1.bf16.msra.mxu0 %v3577_v13  ;;  %v3594_v13 = vld [vmem:[%s4843_s16 + $0x28] sm:$0xff]  }
 0x78c   :  { %1128 = vmatprep.subr.bf16.mxu0 %v3582_v15  ;;  %v3596_v15 = vld [vmem:[%s4843_s16 + $0x30] sm:$0xff]  }
 0x78f   :  { %1129 = vmatpush1.bf16.msra.mxu0 %v3580_v16  ;;  %v3597_v16 = vld [vmem:[%s4843_s16 + $0x78] sm:$0xff]  }
 0x7fe   :  { %v941_v41 = vpop.xlane.xlu0 %940 }
 0x7ff   :  { %v948_v44 = vmul.f32 0.0078125, %v941_v41  ;;  %v2775_v41 = vld [vmem:[%s4840_s13] ss:$0 sm:$0xff] }
 0x800   :  { %v943_v45 = vpop.xlane.xlu1 %942 }
 0x801   :  { %v952_v42 = vsub.f32 %v4256_v34, %v948_v44  ;;  %v949_v46 = vmul.f32 0.0078125, %v943_v45 }
 0x802   :  { %v945_v48 = vpop.xlane.xlu0 %944 }
 0x803   :  { %v953_v47 = vsub.f32 %v4259_v37, %v949_v46  ;;  %v950_v50 = vmul.f32 0.0078125, %v945_v48  ;;  %v956_v43 = vmul.f32 %v952_v42, %v952_v42 }
 0x804   :  { %v947_v39 = vpop.xlane.xlu1 %946 }
 0x805   :  { %v954_v51 = vsub.f32 %v4263_v38, %v950_v50  ;;  %v951_v53 = vmul.f32 0.0078125, %v947_v39  ;;  %960 = vadd.xlane.f32.xlu0 %v956_v43  ;;  %v957_v54 = vmul.f32 %v953_v47, %v953_v47 }
 0x807   :  { %v955_v56 = vsub.f32 %v4267_v40, %v951_v53  ;;  %962 = vadd.xlane.f32.xlu1 %v957_v54  ;;  %v958_v57 = vmul.f32 %v954_v51, %v954_v51 }
 0x809   :  { %964 = vadd.xlane.f32.xlu0 %v958_v57  ;;  %v959_v59 = vmul.f32 %v955_v56, %v955_v56 }
 0x80b   :  { %966 = vadd.xlane.f32.xlu1 %v959_v59  ;;  %v3583_v59 = vld [vmem:[%s4843_s16 + $0x40] sm:$0xff]  }
 0x80c   :  { %3055 = vmatprep.subr.bf16.mxu1 %v3583_v59 }
 0x892   :  { %v961_v17 = vpop.xlane.xlu0 %960 }
 0x893   :  { %v968_v18 = vmul.f32 0.0078125, %v961_v17  ;;  %v3598_v17 = vld [vmem:[%s4843_s16 + $0x38] sm:$0xff]  }
 0x894   :  { %v963_v19 = vpop.xlane.xlu1 %962 }
 0x895   :  { %v972_v20 = vadd.f32 1e-06, %v968_v18  ;;  %v969_v21 = vmul.f32 0.0078125, %v963_v19  ;;  %v1022_v18 = vld [vmem:[%s4842_s15] sm:$0x3] }
 0x896   :  { %v965_v23 = vpop.xlane.xlu0 %964  ;;  %v1027_v19 = vrot.slane %v1022_v18, %v4170_v7 }
 0x897   :  { %3703 = vrsqrt.f32 %v972_v20  ;;  %v973_v24 = vadd.f32 1e-06, %v969_v21  ;;  %v970_v26 = vmul.f32 0.0078125, %v965_v23  ;;  %v1031_v20 = vrot.slane %v1022_v18, %v4176_v9 }
 0x898   :  { %v967_v27 = vpop.xlane.xlu1 %966 }
 0x899   :  { %3705 = vrsqrt.f32 %v973_v24  ;;  %v974_v28 = vadd.f32 1e-06, %v970_v26  ;;  %v971_v31 = vmul.f32 0.0078125, %v967_v27 }
 0x89b   :  { %3707 = vrsqrt.f32 %v974_v28  ;;  %v975_v32 = vadd.f32 1e-06, %v971_v31 }
 0x89d   :  { %3709 = vrsqrt.f32 %v975_v32 }
 0x8a1   :  { %v3704_v33 = vpop.eup %3703 }
 0x8a2   :  { %v980_v36 = vmul.f32 %v3704_v33, %v952_v42 }
 0x8a3   :  { %v3706_v25 = vpop.eup %3705 }
 0x8a4   :  { %v981_v30 = vmul.f32 %v3706_v25, %v953_v47  ;;  %v990_v22 = vmul.f32 %v2774_v35, %v980_v36 }
 0x8a5   :  { %v3708_v29 = vpop.eup %3707 }
 0x8a6   :  { %v991_v44 = vmul.f32 %v2774_v35, %v981_v30  ;;  %v1000_v46 = vadd.f32 %v2775_v41, %v990_v22  ;;  %v982_v50 = vmul.f32 %v3708_v29, %v954_v51  ;;  %v3584_v51 = vld [vmem:[%s4843_s16] sm:$0xff]  }
 0x8a7   :  { %v3710_v45 = vpop.eup %3709  ;;  %3056 = vmatpush3.bf16.msra.mxu1 %v3584_v51 }
 0x8a8   :  { %v1001_v48 = vadd.f32 %v2775_v41, %v991_v44  ;;  %v983_v43 = vmul.f32 %v3710_v45, %v955_v56  ;;  %v992_v54 = vmul.f32 %v2774_v35, %v982_v50  ;;  %v3585_v56 = vld [vmem:[%s4843_s16 + $0x48] sm:$0xff]  }
 0x8a9   :  { %3057 = vmatprep.subr.bf16.mxu1 %v3585_v56 }
 0x8aa   :  { %v1004_v39 = vpack.c.bf16 %v1001_v48, %v1000_v46  ;;  %v993_v53 = vmul.f32 %v2774_v35, %v983_v43  ;;  %v1002_v47 = vadd.f32 %v2775_v41, %v992_v54 }
 0x8ab   :  { %3058 = vmatpush3.bf16.msra.mxu1 %v3586_v60 }
 0x8ac   :  { %1147 = vmatmul.mubr.bf16.vlgmr.msra.gmra.mrb[16].mxu0 %v1004_v39  ;;  %v1003_v42 = vadd.f32 %v2775_v41, %v993_v53  ;;  %3059 = vmatprep.subr.bf16.mxu1 %v3587_v62 }
 0x8ad   :  { %1156 = vmatprep.mubr.bf16.mxu0 %v3811_v6 }
 0x8ae   :  { %v1005_v57 = vpack.c.bf16 %v1003_v42, %v1002_v47 }
 0x8af   :  { %3060 = vmatpush3.bf16.msra.mxu1 %v3588_v63 }
 0x8b0   :  { %3061 = vmatprep.subr.bf16.mxu1 %v3589_v1 }
 0x8b3   :  { %3062 = vmatpush3.bf16.msra.mxu1 %v3590_v2 }
 0x8b4   :  { %1157 = vmatmul.mubr.bf16.gmra.mrb[20].mxu0 %v1005_v57  ;;  %3063 = vmatprep.subr.bf16.mxu1 %v3591_v4 }
 0x8b5   :  { %1712 = vmatprep.mubr.bf16.mxu0 %v3811_v6 }
 0x8b7   :  { %3064 = vmatpush3.bf16.msra.mxu1 %v3592_v8 }
 0x8b8   :  { %3065 = vmatprep.subr.bf16.mxu1 %v3593_v12 }
 0x8bb   :  { %3066 = vmatpush3.bf16.msra.mxu1 %v3594_v13 }
 0x8bc   :  { %3067 = vmatprep.subr.bf16.mxu1 %v3595_v14 }
 0x8bf   :  { %3068 = vmatpush3.bf16.msra.mxu1 %v3596_v15 }
 0x8c0   :  { %3069 = vmatprep.subr.bf16.mxu1 %v3597_v16 }
 0x8c3   :  { %3070 = vmatpush3.bf16.msra.mxu1 %v3598_v17 }
 0x97f   :  { %v1148_v21 = vpop.f32.mrb[16].mxu0 }
 0x980   :  { %v4384_v23 = vadd.f32 %v1148_v21, %v1027_v19  ;;  %v1150_v24 = vpop.f32.mrb[17].mxu0 }
 0x981   :  { %v4386_v26 = vadd.f32 %v1150_v24, %v1031_v20  ;;  %v1152_v27 = vpop.f32.mrb[18].mxu0 }
 0x982   :  { %v1175_v28 = vmul.f32 0.044715, %v4384_v23  ;;  %v4389_v31 = vadd.f32 %v1152_v27, %v1027_v19  ;;  %v1154_v32 = vpop.f32.mrb[19].mxu0 }
 0x983   :  { %v1176_v33 = vmul.f32 0.044715, %v4386_v26  ;;  %v4392_v35 = vadd.f32 %v1154_v32, %v1031_v20 }
 0x984   :  { %v1183_v36 = vmul.f32 %v1175_v28, %v4384_v23  ;;  %v1177_v25 = vmul.f32 0.044715, %v4389_v31 }
 0x985   :  { %v1184_v30 = vmul.f32 %v1176_v33, %v4386_v26  ;;  %v1178_v22 = vmul.f32 0.044715, %v4392_v35 }
 0x986   :  { %v1191_v29 = vmul.f32 %v1183_v36, %v4384_v23  ;;  %v1185_v41 = vmul.f32 %v1177_v25, %v4389_v31 }
 0x987   :  { %v1192_v44 = vmul.f32 %v1184_v30, %v4386_v26  ;;  %v1186_v45 = vmul.f32 %v1178_v22, %v4392_v35  ;;  %v1158_v46 = vpop.f32.mrb[20].mxu0 }
 0x988   :  { %v1199_v48 = vadd.f32 %v1191_v29, %v4384_v23  ;;  %v1193_v50 = vmul.f32 %v1185_v41, %v4389_v31  ;;  %v4404_v43 = vadd.f32 %v1158_v46, %v1027_v19  ;;  %v1160_v39 = vpop.f32.mrb[21].mxu0 }
 0x989   :  { %v1194_v53 = vmul.f32 %v1186_v45, %v4392_v35  ;;  %v4407_v54 = vadd.f32 %v1160_v39, %v1031_v20  ;;  %v1162_v42 = vpop.f32.mrb[22].mxu0  ;;  %v1200_v47 = vadd.f32 %v1192_v44, %v4386_v26 }
 0x98a   :  { %v1207_v57 = vmul.f32 0.7978846, %v1199_v48  ;;  %v1201_v59 = vadd.f32 %v1193_v50, %v4389_v31  ;;  %v1179_v51 = vmul.f32 0.044715, %v4404_v43  ;;  %v1163_v56 = vadd.f32 %v1162_v42, %v1027_v19  ;;  %v1164_v60 = vpop.f32.mrb[23].mxu0 }
 0x98b   :  { %v1180_v62 = vmul.f32 0.044715, %v4407_v54  ;;  %v1165_v63 = vadd.f32 %v1164_v60, %v1031_v20  ;;  %v1202_v1 = vadd.f32 %v1194_v53, %v4392_v35  ;;  %v1208_v2 = vmul.f32 0.7978846, %v1200_v47 }
 0x98c   :  { %3711 = vtanh.f32 %v1207_v57  ;;  %v1209_v4 = vmul.f32 0.7978846, %v1201_v59  ;;  %v1187_v8 = vmul.f32 %v1179_v51, %v4404_v43  ;;  %v1181_v12 = vmul.f32 0.044715, %v1163_v56 }
 0x98d   :  { %v1188_v13 = vmul.f32 %v1180_v62, %v4407_v54  ;;  %v1182_v14 = vmul.f32 0.044715, %v1165_v63  ;;  %v1210_v15 = vmul.f32 0.7978846, %v1202_v1  ;;  %3713 = vtanh.f32 %v1208_v2 }
 0x98e   :  { %3715 = vtanh.f32 %v1209_v4  ;;  %v1195_v16 = vmul.f32 %v1187_v8, %v4404_v43  ;;  %v1189_v17 = vmul.f32 %v1181_v12, %v1163_v56  ;;  %v1167_v48 = vmul.f32 0.5, %v4384_v23 }
 0x98f   :  { %v1196_v18 = vmul.f32 %v1188_v13, %v4407_v54  ;;  %v1190_v19 = vmul.f32 %v1182_v14, %v1165_v63  ;;  %3717 = vtanh.f32 %v1210_v15  ;;  %v1169_v50 = vmul.f32 0.5, %v4389_v31 }
 0x990   :  { %v1197_v20 = vmul.f32 %v1189_v17, %v1163_v56  ;;  %v1203_v21 = vadd.f32 %v1195_v16, %v4404_v43  ;;  %v1168_v53 = vmul.f32 0.5, %v4386_v26  ;;  %v1170_v42 = vmul.f32 0.5, %v4392_v35 }
 0x991   :  { %v1198_v24 = vmul.f32 %v1190_v19, %v1165_v63  ;;  %v1204_v27 = vadd.f32 %v1196_v18, %v4407_v54  ;;  %v1171_v31 = vmul.f32 0.5, %v4404_v43  ;;  %v1173_v26 = vmul.f32 0.5, %v1163_v56 }
 0x992   :  { %v1205_v28 = vadd.f32 %v1197_v20, %v1163_v56  ;;  %v1211_v32 = vmul.f32 0.7978846, %v1203_v21  ;;  %v1172_v35 = vmul.f32 0.5, %v4407_v54  ;;  %v1174_v15 = vmul.f32 0.5, %v1165_v63 }
 0x993   :  { %v1206_v33 = vadd.f32 %v1198_v24, %v1165_v63  ;;  %v1212_v36 = vmul.f32 0.7978846, %v1204_v27 }
 0x994   :  { %v1213_v25 = vmul.f32 0.7978846, %v1205_v28  ;;  %3719 = vtanh.f32 %v1211_v32  ;;  %v2792_v28 = vld [vmem:[%s4844_s17] ss:$0 sm:$0xff] }
 0x995   :  { %v1214_v30 = vmul.f32 0.7978846, %v1206_v33  ;;  %3721 = vtanh.f32 %v1212_v36 }
 0x996   :  { %v3712_v22 = vpop.eup %3711  ;;  %3723 = vtanh.f32 %v1213_v25 }
 0x997   :  { %v3714_v29 = vpop.eup %3713  ;;  %v1223_v41 = vadd.f32 1.0, %v3712_v22  ;;  %3725 = vtanh.f32 %v1214_v30 }
 0x998   :  { %v3716_v44 = vpop.eup %3715  ;;  %v1224_v45 = vadd.f32 1.0, %v3714_v29 }
 0x999   :  { %v3718_v46 = vpop.eup %3717  ;;  %v1225_v39 = vadd.f32 1.0, %v3716_v44  ;;  %v1231_v57 = vmul.f32 %v1223_v41, %v1167_v48 }
 0x99a   :  { %v1226_v47 = vadd.f32 1.0, %v3718_v46  ;;  %v1232_v51 = vmul.f32 %v1224_v45, %v1168_v53  ;;  %v3601_v53 = vld [vmem:[%s4835_s8 + $0xc4] ss:$12 sps:$4 sm:$0xff]  }
 0x99b   :  { %v1233_v59 = vmul.f32 %v1225_v39, %v1169_v50  ;;  %1680 = vmatprep.subr.bf16.mxu0 %v3601_v53 }
 0x99c   :  { %v1234_v60 = vmul.f32 %v1226_v47, %v1170_v42 }
 0x99d   :  { %v1239_v62 = vpack.c.bf16 %v1233_v59, %v1231_v57 }
 0x99e   :  { %v3720_v1 = vpop.eup %3719  ;;  %v1240_v2 = vpack.c.bf16 %v1234_v60, %v1232_v51 }
 0x99f   :  { %v3722_v4 = vpop.eup %3721  ;;  %v1227_v8 = vadd.f32 1.0, %v3720_v1 }
 0x9a0   :  { %v3724_v12 = vpop.eup %3723  ;;  %1410 = vmatprep.mubr.bf16.mxu1 %v1240_v2  ;;  %v1228_v23 = vadd.f32 1.0, %v3722_v4 }
 0x9a1   :  { %v3726_v13 = vpop.eup %3725  ;;  %1411 = vmatmul.mubr.bf16.vlgmr.msra.gmra.mrb[16].mxu1 %v1239_v62  ;;  %v1229_v14 = vadd.f32 1.0, %v3724_v12  ;;  %v1235_v17 = vmul.f32 %v1227_v8, %v1171_v31 }
 0x9a2   :  { %v1230_v16 = vadd.f32 1.0, %v3726_v13  ;;  %v1236_v19 = vmul.f32 %v1228_v23, %v1172_v35  ;;  %v3608_v35 = vld [vmem:[%s4835_s8 + $0xc8] ss:$12 sps:$4 sm:$0xff]  }
 0x9a3   :  { %v1237_v18 = vmul.f32 %v1229_v14, %v1173_v26  ;;  %v3607_v14 = vld [vmem:[%s4835_s8 + $0xf4] ss:$12 sps:$4 sm:$0xff]   ;;  %3309 = vmatprep.subr.bf16.mxu1 %v3608_v35 }
 0x9a4   :  { %v1238_v20 = vmul.f32 %v1230_v16, %v1174_v15  ;;  %v3605_v15 = vld [vmem:[%s4835_s8 + $0xf0] ss:$12 sps:$4 sm:$0xff]   ;;  %3310 = vmatpush3.bf16.msra.mxu1 %v3608_v35  ;;  %v3611_v16 = vld [vmem:[%s4835_s8 + $0x10c] ss:$12 sps:$4 sm:$0xff]  }
 0x9a5   :  { %v1241_v21 = vpack.c.bf16 %v1237_v18, %v1235_v17  ;;  %v3612_v17 = vld [vmem:[%s4835_s8 + $0xe0] ss:$12 sps:$4 sm:$0xff]   ;;  %v3609_v18 = vld [vmem:[%s4835_s8 + $0x108] ss:$12 sps:$4 sm:$0xff]  }
 0x9a6   :  { %v1242_v24 = vpack.c.bf16 %v1238_v20, %v1236_v19  ;;  %3311 = vmatprep.subr.bf16.mxu1 %v3612_v17  ;;  %v3615_v19 = vld [vmem:[%s4835_s8 + $0x124] ss:$12 sps:$4 sm:$0xff]  }
 0x9a7   :  { %v3616_v20 = vld [vmem:[%s4835_s8 + $0xf8] ss:$12 sps:$4 sm:$0xff]  }
 0x9a8   :  { %1418 = vmatprep.mubr.bf16.mxu1 %v1242_v24  ;;  %3312 = vmatpush3.bf16.msra.mxu1 %v3612_v17  ;;  %v3619_v24 = vld [vmem:[%s4835_s8 + $0x13c] ss:$12 sps:$4 sm:$0xff]  }
 0x9a9   :  { %1419 = vmatmul.mubr.bf16.gmra.mrb[20].mxu1 %v1241_v21  ;;  %v3613_v21 = vld [vmem:[%s4835_s8 + $0x120] ss:$12 sps:$4 sm:$0xff]   ;;  %3313 = vmatprep.subr.bf16.mxu1 %v3616_v20 }
 0x9ac   :  { %3314 = vmatpush3.bf16.msra.mxu1 %v3616_v20 }
 0xa74   :  { %v3071_v27 = vpop.f32.mrb[16].mxu1 }
 0xa75   :  { %v3072_v43 = vpop.f32.mrb[17].mxu1 }
 0xa76   :  { %v3073_v56 = vadd.f32 %v3072_v43, %v3071_v27  ;;  %v3074_v32 = vpop.f32.mrb[18].mxu1  ;;  %v3620_v27 = vld [vmem:[%s4835_s8 + $0x110] ss:$12 sps:$4 sm:$0xff]   ;;  %v3623_v43 = vld [vmem:[%s4835_s8 + $0x154] ss:$12 sps:$4 sm:$0xff]  }
 0xa77   :  { %v3075_v33 = vpop.f32.mrb[19].mxu1  ;;  %3315 = vmatprep.subr.bf16.mxu1 %v3620_v27 }
 0xa78   :  { %v1413_v54 = vadd.f32 %v3073_v56, %v2792_v28  ;;  %v3076_v63 = vadd.f32 %v3075_v33, %v3074_v32  ;;  %v3624_v56 = vld [vmem:[%s4835_s8 + $0x128] ss:$12 sps:$4 sm:$0xff]   ;;  %3316 = vmatpush3.bf16.msra.mxu1 %v3620_v27  ;;  %v3621_v32 = vld [vmem:[%s4835_s8 + $0x150] ss:$12 sps:$4 sm:$0xff]   ;;  %v3627_v33 = vld [vmem:[%s4835_s8 + $0x16c] ss:$12 sps:$4 sm:$0xff]  }
 0xa79   :  { %3317 = vmatprep.subr.bf16.mxu1 %v3624_v56 }
 0xa7a   :  { %v1416_v36 = vadd.f32 %v3076_v63, %v2792_v28  ;;  %v4430_v25 = vadd.f32 %v1413_v54, %v4256_v34  ;;  %v3628_v54 = vld [vmem:[%s4835_s8 + $0x140] ss:$12 sps:$4 sm:$0xff]   ;;  %v3625_v63 = vld [vmem:[%s4835_s8 + $0x168] ss:$12 sps:$4 sm:$0xff]  }
 0xa7c   :  { %1435 = vadd.xlane.f32.xlu0 %v4430_v25  ;;  %v3077_v30 = vpop.f32.mrb[20].mxu1  ;;  %v4434_v22 = vadd.f32 %v1416_v36, %v4259_v37  ;;  %v3599_v37 = vld [vmem:[%s4835_s8 + $0xc0] ss:$12 sps:$4 sm:$0xff]   ;;  %3318 = vmatpush3.bf16.msra.mxu1 %v3624_v56  ;;  %v3629_v36 = vld [vmem:[%s4835_s8 + $0x158] ss:$12 sps:$4 sm:$0xff]  }
 0xa7d   :  { %v3078_v29 = vpop.f32.mrb[21].mxu1  ;;  %1681 = vmatpush1.bf16.msra.mxu0 %v3599_v37  ;;  %3319 = vmatprep.subr.bf16.mxu1 %v3628_v54 }
 0xa7e   :  { %v3079_v41 = vadd.f32 %v3078_v29, %v3077_v30  ;;  %1437 = vadd.xlane.f32.xlu1 %v4434_v22  ;;  %v3080_v44 = vpop.f32.mrb[22].mxu1  ;;  %v3630_v30 = vld [vmem:[%s4835_s8 + $0x170] ss:$12 sps:$4 sm:$0xff]  }
 0xa7f   :  { %v3081_v45 = vpop.f32.mrb[23].mxu1 }
 0xa80   :  { %v1421_v46 = vadd.f32 %v3079_v41, %v2792_v28  ;;  %v3082_v48 = vadd.f32 %v3081_v45, %v3080_v44  ;;  %3320 = vmatpush3.bf16.msra.mxu1 %v3628_v54 }
 0xa81   :  { %3321 = vmatprep.subr.bf16.mxu1 %v3629_v36 }
 0xa82   :  { %v1424_v50 = vadd.f32 %v3082_v48, %v2792_v28  ;;  %v4438_v39 = vadd.f32 %v1421_v46, %v4263_v38  ;;  %v3604_v38 = vld [vmem:[%s4835_s8 + $0xdc] ss:$12 sps:$4 sm:$0xff]   ;;  %v3617_v28 = vld [vmem:[%s4835_s8 + $0x138] ss:$12 sps:$4 sm:$0xff]  }
 0xa83   :  { %1682 = vmatprep.subr.bf16.mxu0 %v3604_v38 }
 0xa84   :  { %1439 = vadd.xlane.f32.xlu0 %v4438_v39  ;;  %v4442_v34 = vadd.f32 %v1424_v50, %v4267_v40  ;;  %v3602_v40 = vld [vmem:[%s4835_s8 + $0xd8] ss:$12 sps:$4 sm:$0xff]   ;;  %3322 = vmatpush3.bf16.msra.mxu1 %v3629_v36 }
 0xa85   :  { %1683 = vmatpush1.bf16.msra.mxu0 %v3602_v40  ;;  %3323 = vmatprep.subr.bf16.mxu1 %v3630_v30 }
 0xa86   :  { %1441 = vadd.xlane.f32.xlu1 %v4442_v34  ;;  %1684 = vmatprep.subr.bf16.mxu0 %v3607_v14 }
 0xa88   :  { %3324 = vmatpush3.bf16.msra.mxu1 %v3630_v30 }
 0xa89   :  { %1685 = vmatpush1.bf16.msra.mxu0 %v3605_v15  ;;  %3460 = vmatprep.subr.bf16.mxu1 %v4082_v10 }
 0xa8a   :  { %1686 = vmatprep.subr.bf16.mxu0 %v3611_v16 }
 0xa8d   :  { %1687 = vmatpush1.bf16.msra.mxu0 %v3609_v18 }
 0xa8e   :  { %1688 = vmatprep.subr.bf16.mxu0 %v3615_v19 }
 0xa91   :  { %1689 = vmatpush1.bf16.msra.mxu0 %v3613_v21 }
 0xa92   :  { %1690 = vmatprep.subr.bf16.mxu0 %v3619_v24 }
 0xa95   :  { %1691 = vmatpush1.bf16.msra.mxu0 %v3617_v28 }
 0xa96   :  { %1692 = vmatprep.subr.bf16.mxu0 %v3623_v43 }
 0xa99   :  { %1693 = vmatpush1.bf16.msra.mxu0 %v3621_v32 }
 0xa9a   :  { %1694 = vmatprep.subr.bf16.mxu0 %v3627_v33 }
 0xa9d   :  { %1695 = vmatpush1.bf16.msra.mxu0 %v3625_v63 }
 0xb09   :  { %v1436_v42 = vpop.xlane.xlu0 %1435 }
 0xb0a   :  { %v1443_v47 = vmul.f32 0.0078125, %v1436_v42 }
 0xb0b   :  { %v1438_v57 = vpop.xlane.xlu1 %1437 }
 0xb0c   :  { %v4458_v59 = vsub.f32 %v4430_v25, %v1443_v47  ;;  %v1444_v51 = vmul.f32 0.0078125, %v1438_v57  ;;  %v2811_v57 = vld [vmem:[%s4833_s6 + $0x1] ss:$0 sm:$0xff] }
 0xb0e   :  { %v4461_v60 = vsub.f32 %v4434_v22, %v1444_v51  ;;  %v1451_v62 = vmul.f32 %v4458_v59, %v4458_v59 }
 0xb10   :  { %1455 = vadd.xlane.f32.xlu0 %v1451_v62  ;;  %v1452_v1 = vmul.f32 %v4461_v60, %v4461_v60 }
 0xb11   :  { %v1440_v2 = vpop.xlane.xlu0 %1439 }
 0xb12   :  { %v1445_v4 = vmul.f32 0.0078125, %v1440_v2  ;;  %1457 = vadd.xlane.f32.xlu1 %v1452_v1 }
 0xb13   :  { %v1442_v8 = vpop.xlane.xlu1 %1441 }
 0xb14   :  { %v4468_v12 = vsub.f32 %v4438_v39, %v1445_v4  ;;  %v1446_v23 = vmul.f32 0.0078125, %v1442_v8  ;;  %v2812_v4 = vld [vmem:[%s4834_s7 + $0x1] ss:$0 sm:$0xff] }
 0xb16   :  { %v4471_v13 = vsub.f32 %v4442_v34, %v1446_v23  ;;  %v1453_v31 = vmul.f32 %v4468_v12, %v4468_v12 }
 0xb18   :  { %1459 = vadd.xlane.f32.xlu0 %v1453_v31  ;;  %v1454_v26 = vmul.f32 %v4471_v13, %v4471_v13 }
 0xb1a   :  { %1461 = vadd.xlane.f32.xlu1 %v1454_v26 }
 0xb9d   :  { %v1456_v29 = vpop.xlane.xlu0 %1455 }
 0xb9e   :  { %v1463_v41 = vmul.f32 0.0078125, %v1456_v29 }
 0xb9f   :  { %v1458_v44 = vpop.xlane.xlu1 %1457 }
 0xba0   :  { %v1467_v45 = vadd.f32 1e-06, %v1463_v41  ;;  %v1464_v46 = vmul.f32 0.0078125, %v1458_v44 }
 0xba2   :  { %3727 = vrsqrt.f32 %v1467_v45  ;;  %v1468_v48 = vadd.f32 1e-06, %v1464_v46 }
 0xba4   :  { %3729 = vrsqrt.f32 %v1468_v48 }
 0xba5   :  { %v1460_v50 = vpop.xlane.xlu0 %1459 }
 0xba6   :  { %v1465_v37 = vmul.f32 0.0078125, %v1460_v50 }
 0xba7   :  { %v1462_v53 = vpop.xlane.xlu1 %1461 }
 0xba8   :  { %v1469_v38 = vadd.f32 1e-06, %v1465_v37  ;;  %v1466_v40 = vmul.f32 0.0078125, %v1462_v53 }
 0xbaa   :  { %3731 = vrsqrt.f32 %v1469_v38  ;;  %v1470_v42 = vadd.f32 1e-06, %v1466_v40 }
 0xbac   :  { %v3728_v47 = vpop.eup %3727  ;;  %3733 = vrsqrt.f32 %v1470_v42 }
 0xbad   :  { %v1475_v51 = vmul.f32 %v3728_v47, %v4458_v59 }
 0xbae   :  { %v3730_v62 = vpop.eup %3729 }
 0xbaf   :  { %v1485_v1 = vmul.f32 %v2811_v57, %v1475_v51  ;;  %v1476_v2 = vmul.f32 %v3730_v62, %v4461_v60 }
 0xbb1   :  { %v1486_v8 = vmul.f32 %v2811_v57, %v1476_v2  ;;  %v1495_v23 = vadd.f32 %v2812_v4, %v1485_v1 }
 0xbb3   :  { %v1496_v31 = vadd.f32 %v2812_v4, %v1486_v8 }
 0xbb4   :  { %v3732_v26 = vpop.eup %3731 }
 0xbb5   :  { %v1499_v14 = vpack.c.bf16 %v1496_v31, %v1495_v23  ;;  %v1477_v35 = vmul.f32 %v3732_v26, %v4468_v12  ;;  %v2845_v12 = vld [vmem:[%s4836_s9 + $0x3] sm:$0x7] }
 0xbb6   :  { %v3734_v15 = vpop.eup %3733  ;;  %v1544_v21 = vrot.slane %v2845_v12, %v4176_v9  ;;  %v1548_v63 = vrot.slane %v2845_v12, %v342_v11 }
 0xbb7   :  { %1713 = vmatmul.mubr.bf16.vlgmr.msra.gmra.mrb[24].mxu0 %v1499_v14  ;;  %3325 = vmatprep.mubr.bf16.mxu1 %v1499_v14  ;;  %v1478_v59 = vmul.f32 %v3734_v15, %v4471_v13  ;;  %v1487_v16 = vmul.f32 %v2811_v57, %v1477_v35  ;;  %v1540_v13 = vrot.slane %v2845_v12, %v4170_v7 }
 0xbb8   :  { %1722 = vmatprep.mubr.bf16.mxu0 %v3811_v6 }
 0xbb9   :  { %v1488_v60 = vmul.f32 %v2811_v57, %v1478_v59  ;;  %v1497_v17 = vadd.f32 %v2812_v4, %v1487_v16  ;;  %v3783_v16 = vld [vmem:[%s4861_s3] sm:$0xff] }
 0xbbb   :  { %v1498_v18 = vadd.f32 %v2812_v4, %v1488_v60 }
 0xbbd   :  { %v1500_v19 = vpack.c.bf16 %v1498_v18, %v1497_v17 }
 0xbbf   :  { %1723 = vmatmul.mubr.bf16.gmra.mrb[28].mxu0 %v1500_v19  ;;  %3326 = vmatmul.mubr.bf16.vlgmr.msra.gmra.mrb[24].mxu1 %v1500_v19  ;;  %v3784_v19 = vld [vmem:[%s4861_s3 + $0x8] sm:$0xff] }
 0xbc0   :  { %3462 = vmatpush3.bf16.msra.mxu1 %v4082_v10 }
 0xbc1   :  { %3464 = vmatprep.subr.bf16.mxu1 %v4102_v49 }
 0xbc4   :  { %3466 = vmatpush3.bf16.msra.mxu1 %v4102_v49 }
 0xbc5   :  { %3468 = vmatprep.subr.bf16.mxu1 %v4112_v52 }
 0xbc8   :  { %3470 = vmatpush3.bf16.msra.mxu1 %v4112_v52 }
 0xbc9   :  { %3472 = vmatprep.subr.bf16.mxu1 %v4122_v55 }
 0xbcc   :  { %3474 = vmatpush3.bf16.msra.mxu1 %v4122_v55 }
 0xbcd   :  { %3476 = vmatprep.subr.bf16.mxu1 %v4133_v58 }
 0xbd0   :  { %3478 = vmatpush3.bf16.msra.mxu1 %v4133_v58 }
 0xbd1   :  { %3480 = vmatprep.subr.bf16.mxu1 %v4143_v61 }
 0xbd4   :  { %3482 = vmatpush3.bf16.msra.mxu1 %v4143_v61 }
 0xbd5   :  { %3484 = vmatprep.subr.bf16.mxu1 %v4153_v0 }
 0xbd8   :  { %3486 = vmatpush3.bf16.msra.mxu1 %v4153_v0 }
 0xbd9   :  { %3488 = vmatprep.subr.bf16.mxu1 %v4163_v3 }
 0xbdc   :  { %3490 = vmatpush3.bf16.msra.mxu1 %v4163_v3 }
 0xc8a   :  { %v1714_v20 = vpop.f32.mrb[24].mxu0 }
 0xc8b   :  { %v1716_v24 = vpop.f32.mrb[25].mxu0  ;;  %v1715_v28 = vadd.f32 %v1714_v20, %v1540_v13 }
 0xc8c   :  { %v1718_v27 = vpop.f32.mrb[26].mxu0  ;;  %v1717_v32 = vadd.f32 %v1716_v24, %v1544_v21 }
 0xc8d   :  { %v1719_v43 = vadd.f32 %v1718_v27, %v1540_v13  ;;  %v1720_v56 = vpop.f32.mrb[27].mxu0 }
 0xc8e   :  { %v1721_v33 = vadd.f32 %v1720_v56, %v1544_v21 }
 0xc8f   :  { %v1782_v54 = vpack.c.bf16 %v1719_v43, %v1715_v28 }
 0xc90   :  { %v1784_v36 = vpack.c.bf16 %v1721_v33, %v1717_v32 }
 0xc91   :  { %3345 = vmatprep.mubr.bf16.mxu0 %v1782_v54 }
 0xc92   :  { %v1724_v30 = vpop.f32.mrb[28].mxu0  ;;  %v3327_v29 = vpop.f32.mrb[24].mxu1  ;;  %v1788_v41 = vmul.bf16 %v1784_v36, %v4082_v10  ;;  %v1790_v23 = vmul.bf16 %v1784_v36, %v4112_v52  ;;  %v1792_v26 = vmul.bf16 %v1784_v36, %v4133_v58 }
 0xc93   :  { %v1725_v44 = vadd.f32 %v1724_v30, %v1540_v13  ;;  %v1776_v45 = vadd.f32 %v3327_v29, %v1548_v63  ;;  %v1726_v46 = vpop.f32.mrb[29].mxu0  ;;  %v1767_v48 = vpop.f32.mrb[25].mxu1 }
 0xc94   :  { %v1728_v50 = vpop.f32.mrb[30].mxu0  ;;  %v3328_v37 = vpop.f32.mrb[26].mxu1  ;;  %3329 = vmatprep.subr.bf16.mxu0 %v1788_v41  ;;  %v1727_v5 = vadd.f32 %v1726_v46, %v1544_v21  ;;  %v1768_v11 = vadd.f32 %v1767_v48, %v1548_v63 }
 0xc95   :  { %v1729_v53 = vadd.f32 %v1728_v50, %v1540_v13  ;;  %v1779_v38 = vadd.f32 %v3328_v37, %v1548_v63  ;;  %v1730_v40 = vpop.f32.mrb[31].mxu0  ;;  %v1770_v42 = vpop.f32.mrb[27].mxu1  ;;  %3330 = vmatpush3.bf16.xpose.msra.mxu0 %v1788_v41  ;;  %v3785_v13 = vld [vmem:[%s4861_s3 + $0x10] sm:$0xff] }
 0xc96   :  { %v1731_v47 = vadd.f32 %v1730_v40, %v1544_v21  ;;  %v1771_v57 = vadd.f32 %v1770_v42, %v1548_v63  ;;  %v3786_v21 = vld [vmem:[%s4861_s3 + $0x18] sm:$0xff]  ;;  %v3635_v40 = vld [vmem:[%s4837_s10 + $0x60] sm:$0xff]   ;;  %v3636_v42 = vld [vmem:[%s4837_s10 + $0x68] sm:$0xff]  }
 0xc97   :  { %v1783_v51 = vpack.c.bf16 %v1729_v53, %v1725_v44  ;;  %v4572_v62 = vpack.c.bf16 %v1779_v38, %v1776_v45 }
 0xc98   :  { %v1785_v1 = vpack.c.bf16 %v1731_v47, %v1727_v5  ;;  %v4574_v2 = vpack.c.bf16 %v1771_v57, %v1768_v11  ;;  %v3637_v5 = vld [vmem:[%s4837_s10 + $0x70] sm:$0xff]  }
 0xc99   :  { %v1797_v46 = vmul.bf16 %v4572_v62, %v4102_v49  ;;  %v1799_v53 = vmul.bf16 %v4572_v62, %v4122_v55 }
 0xc9a   :  { %v1789_v4 = vmul.bf16 %v1785_v1, %v4102_v49  ;;  %v1796_v8 = vmul.bf16 %v4574_v2, %v4082_v10  ;;  %v1791_v31 = vmul.bf16 %v1785_v1, %v4122_v55  ;;  %v1793_v14 = vmul.bf16 %v1785_v1, %v4143_v61 }
 0xc9b   :  { %v1794_v10 = vmul.bf16 %v1784_v36, %v4153_v0  ;;  %v1795_v35 = vmul.bf16 %v1785_v1, %v4163_v3  ;;  %v1798_v37 = vmul.bf16 %v4574_v2, %v4112_v52  ;;  %v1800_v38 = vmul.bf16 %v4574_v2, %v4133_v58  ;;  %v3631_v58 = vld [vmem:[%s4837_s10 + $0x40] sm:$0xff]  }
 0xc9c   :  { %3331 = vmatprep.subr.bf16.mxu0 %v1789_v4  ;;  %3387 = vmatprep.subr.bf16.mxu1 %v1796_v8  ;;  %v1801_v49 = vmul.bf16 %v4572_v62, %v4143_v61  ;;  %v1802_v52 = vmul.bf16 %v4574_v2, %v4153_v0  ;;  %v1803_v55 = vmul.bf16 %v4572_v62, %v4163_v3  ;;  %v3632_v61 = vld [vmem:[%s4837_s10 + $0x48] sm:$0xff]   ;;  %v3633_v0 = vld [vmem:[%s4837_s10 + $0x50] sm:$0xff]   ;;  %v3634_v3 = vld [vmem:[%s4837_s10 + $0x58] sm:$0xff]  }
 0xc9d   :  { %3332 = vmatpush3.bf16.xpose.msra.mxu0 %v1789_v4 }
 0xc9e   :  { %3333 = vmatprep.subr.bf16.mxu0 %v1790_v23 }
 0xca5   :  { %3334 = vmatpush3.bf16.xpose.msra.mxu0 %v1790_v23 }
 0xca6   :  { %3335 = vmatprep.subr.bf16.mxu0 %v1791_v31 }
 0xcad   :  { %3336 = vmatpush3.bf16.xpose.msra.mxu0 %v1791_v31 }
 0xcae   :  { %3337 = vmatprep.subr.bf16.mxu0 %v1792_v26 }
 0xcb5   :  { %3338 = vmatpush3.bf16.xpose.msra.mxu0 %v1792_v26 }
 0xcb6   :  { %3339 = vmatprep.subr.bf16.mxu0 %v1793_v14 }
 0xcbd   :  { %3340 = vmatpush3.bf16.xpose.msra.mxu0 %v1793_v14 }
 0xcbe   :  { %3341 = vmatprep.subr.bf16.mxu0 %v1794_v10 }
 0xcc5   :  { %3342 = vmatpush3.bf16.xpose.msra.mxu0 %v1794_v10 }
 0xcc6   :  { %3343 = vmatprep.subr.bf16.mxu0 %v1795_v35 }
 0xccd   :  { %3344 = vmatpush3.bf16.xpose.msra.mxu0 %v1795_v35  ;;  %v3638_v35 = vld [vmem:[%s4837_s10 + $0x78] sm:$0xff]  }
 0xcce   :  { %3407 = vmatprep.subr.bf16.mxu0 %v3631_v58 }
 0xcd4   :  { %3346 = vmatmul.mubr.bf16.vlgmr.msra.gmra.mrb[32].mxu0 %v1783_v51 }
 0xcd5   :  { %3408 = vmatpush3.bf16.msra.mxu0 %v3631_v58  ;;  %v3647_v58 = vld [vmem:[%s4841_s14 + $0xa4] ss:$8 sps:$4 sm:$0xff]  }
 0xcd6   :  { %3409 = vmatprep.subr.bf16.mxu0 %v3632_v61 }
 0xcd9   :  { %3410 = vmatpush3.bf16.msra.mxu0 %v3632_v61  ;;  %v3645_v61 = vld [vmem:[%s4841_s14 + $0xa0] ss:$8 sps:$4 sm:$0xff]  }
 0xcda   :  { %3411 = vmatprep.subr.bf16.mxu0 %v3633_v0 }
 0xcdd   :  { %3412 = vmatpush3.bf16.msra.mxu0 %v3633_v0  ;;  %v3650_v0 = vld [vmem:[%s4841_s14 + $0xb4] ss:$8 sps:$4 sm:$0xff]  }
 0xcde   :  { %3413 = vmatprep.subr.bf16.mxu0 %v3634_v3 }
 0xce1   :  { %3414 = vmatpush3.bf16.msra.mxu0 %v3634_v3  ;;  %v3648_v3 = vld [vmem:[%s4841_s14 + $0xb0] ss:$8 sps:$4 sm:$0xff]  }
 0xce2   :  { %3415 = vmatprep.subr.bf16.mxu0 %v3635_v40 }
 0xce5   :  { %3416 = vmatpush3.bf16.msra.mxu0 %v3635_v40  ;;  %v3653_v40 = vld [vmem:[%s4841_s14 + $0xc4] ss:$8 sps:$4 sm:$0xff]  }
 0xce6   :  { %3417 = vmatprep.subr.bf16.mxu0 %v3636_v42 }
 0xce9   :  { %3418 = vmatpush3.bf16.msra.mxu0 %v3636_v42  ;;  %v3651_v42 = vld [vmem:[%s4841_s14 + $0xc0] ss:$8 sps:$4 sm:$0xff]  }
 0xcea   :  { %3419 = vmatprep.subr.bf16.mxu0 %v3637_v5 }
 0xced   :  { %3420 = vmatpush3.bf16.msra.mxu0 %v3637_v5  ;;  %v3654_v5 = vld [vmem:[%s4841_s14 + $0xd0] ss:$8 sps:$4 sm:$0xff]  }
 0xcee   :  { %3421 = vmatprep.subr.bf16.mxu0 %v3638_v35 }
 0xcf1   :  { %3422 = vmatpush3.bf16.msra.mxu0 %v3638_v35 }
 0xda7   :  { %v3347_v15 = vpop.f32.mrb[32].mxu0 }
 0xda8   :  { %v1838_v59 = vpop.f32.mrb[33].mxu0  ;;  %v1847_v20 = vadd.f32 %v3785_v13, %v3347_v15 }
 0xda9   :  { %v1839_v60 = vadd.f32 %v3783_v16, %v1838_v59  ;;  %v3348_v17 = vpop.f32.mrb[34].mxu0 }
 0xdaa   :  { %v1841_v18 = vpop.f32.mrb[35].mxu0  ;;  %v1850_v24 = vadd.f32 %v3786_v21, %v3348_v17 }
 0xdab   :  { %v1842_v12 = vadd.f32 %v3784_v19, %v1841_v18  ;;  %1853 = vmax.xlane.f32.xlu0 %v1839_v60  ;;  %v2887_v19 = vld [vmem:[%s4838_s11 + $0x1] ss:$0 sm:$0xff] }
 0xdad   :  { %1855 = vmax.xlane.f32.xlu1 %v1842_v12 }
 0xdaf   :  { %1857 = vmax.xlane.f32.xlu0 %v1847_v20 }
 0xdb1   :  { %1859 = vmax.xlane.f32.xlu1 %v1850_v24 }
 0xe38   :  { %v1854_v27 = vpop.xlane.xlu0 %1853 }
 0xe39   :  { %v1861_v28 = vsub.f32 %v1839_v60, %v1854_v27 }
 0xe3a   :  { %v1856_v43 = vpop.xlane.xlu1 %1855 }
 0xe3b   :  { %v1865_v56 = vmul.f32 1.442695, %v1861_v28  ;;  %v1862_v32 = vsub.f32 %v1842_v12, %v1856_v43 }
 0xe3c   :  { %v1858_v33 = vpop.xlane.xlu0 %1857 }
 0xe3d   :  { %3735 = vpow2.f32 %v1865_v56  ;;  %v1867_v54 = vmul.f32 1.442695, %v1862_v32  ;;  %v1863_v63 = vsub.f32 %v1847_v20, %v1858_v33 }
 0xe3e   :  { %v1860_v36 = vpop.xlane.xlu1 %1859 }
 0xe3f   :  { %3737 = vpow2.f32 %v1867_v54  ;;  %v1869_v30 = vmul.f32 1.442695, %v1863_v63  ;;  %v1864_v29 = vsub.f32 %v1850_v24, %v1860_v36 }
 0xe41   :  { %3739 = vpow2.f32 %v1869_v30  ;;  %v1871_v41 = vmul.f32 1.442695, %v1864_v29 }
 0xe43   :  { %3741 = vpow2.f32 %v1871_v41 }
 0xe47   :  { %v3736_v44 = vpop.eup %3735 }
 0xe48   :  { %3381 = vmatprep.mubr.f32.mxu1 %v3736_v44 }
 0xe49   :  { %v3738_v45 = vpop.eup %3737 }
 0xe4a   :  { %3382 = vmatmul.mubr.f32.vlgmr.msra.gmra.mrb[28].mxu1 %v3738_v45 }
 0xe4b   :  { %v3740_v48 = vpop.eup %3739  ;;  %3388 = vmatpush3.bf16.msra.mxu1 %v1796_v8 }
 0xe4c   :  { %3389 = vmatprep.subr.bf16.mxu1 %v1797_v46  ;;  %3384 = vmatprep.mubr.f32.mxu1 %v3740_v48 }
 0xe4d   :  { %v3742_v50 = vpop.eup %3741 }
 0xe4e   :  { %3385 = vmatmul.mubr.f32.gmra.mrb[30].mxu1 %v3742_v50 }
 0xe4f   :  { %3390 = vmatpush3.bf16.msra.mxu1 %v1797_v46 }
 0xe50   :  { %3391 = vmatprep.subr.bf16.mxu1 %v1798_v37 }
 0xe53   :  { %3392 = vmatpush3.bf16.msra.mxu1 %v1798_v37 }
 0xe54   :  { %3393 = vmatprep.subr.bf16.mxu1 %v1799_v53 }
 0xe57   :  { %3394 = vmatpush3.bf16.msra.mxu1 %v1799_v53 }
 0xe58   :  { %3395 = vmatprep.subr.bf16.mxu1 %v1800_v38 }
 0xe5b   :  { %3396 = vmatpush3.bf16.msra.mxu1 %v1800_v38 }
 0xe5c   :  { %3397 = vmatprep.subr.bf16.mxu1 %v1801_v49 }
 0xe5f   :  { %3398 = vmatpush3.bf16.msra.mxu1 %v1801_v49 }
 0xe60   :  { %3399 = vmatprep.subr.bf16.mxu1 %v1802_v52 }
 0xe63   :  { %3400 = vmatpush3.bf16.msra.mxu1 %v1802_v52 }
 0xe64   :  { %3401 = vmatprep.subr.bf16.mxu1 %v1803_v55 }
 0xe67   :  { %3402 = vmatpush3.bf16.msra.mxu1 %v1803_v55 }
 0xf1d   :  { %v3383_v11 = vpop.f32.mrb[28].mxu1 }
 0xf1e   :  { %3743 = vrcp.f32 %v3383_v11  ;;  %v1939_v47 = vpop.f32.mrb[29].mxu1  ;;  %v3656_v11 = vld [vmem:[%s4841_s14 + $0xd4] ss:$8 sps:$4 sm:$0xff]  }
 0xf1f   :  { %3745 = vrcp.f32 %v1939_v47  ;;  %v3659_v47 = vld [vmem:[%s4841_s14 + $0xe4] ss:$8 sps:$4 sm:$0xff]  }
 0xf21   :  { %v3386_v57 = vpop.f32.mrb[30].mxu1 }
 0xf22   :  { %3747 = vrcp.f32 %v3386_v57  ;;  %v1949_v51 = vpop.f32.mrb[31].mxu1  ;;  %v3657_v57 = vld [vmem:[%s4841_s14 + $0xe0] ss:$8 sps:$4 sm:$0xff]  }
 0xf23   :  { %3749 = vrcp.f32 %v1949_v51  ;;  %v3662_v51 = vld [vmem:[%s4841_s14 + $0xf4] ss:$8 sps:$4 sm:$0xff]  }
 0xf28   :  { %v3744_v62 = vpop.eup %3743 }
 0xf29   :  { %v3746_v1 = vpop.eup %3745  ;;  %v1963_v2 = vmul.f32 %v3744_v62, %v3738_v45  ;;  %v3660_v62 = vld [vmem:[%s4841_s14 + $0xf0] ss:$8 sps:$4 sm:$0xff]  }
 0xf2a   :  { %v1962_v4 = vmul.f32 %v3746_v1, %v3736_v44 }
 0xf2c   :  { %v3748_v8 = vpop.eup %3747  ;;  %v1966_v23 = vpack.c.bf16 %v1963_v2, %v1962_v4 }
 0xf2d   :  { %v3750_v31 = vpop.eup %3749  ;;  %v1965_v26 = vmul.f32 %v3748_v8, %v3742_v50 }
 0xf2e   :  { %v1964_v14 = vmul.f32 %v3750_v31, %v3740_v48  ;;  %3403 = vmatprep.mubr.bf16.mxu1 %v1966_v23 }
 0xf30   :  { %v1967_v10 = vpack.c.bf16 %v1965_v26, %v1964_v14 }
 0xf32   :  { %3404 = vmatmul.mubr.bf16.vlgmr.msra.gmra.mrb[32].mxu1 %v1967_v10 }
 0xf33   :  { %2357 = vmatprep.mubr.bf16.mxu1 %v3811_v6 }
0x1005   :  { %v3405_v15 = vpop.f32.mrb[32].mxu1 }
0x1006   :  { %v2002_v59 = vpop.f32.mrb[33].mxu1 }
0x1007   :  { %v3406_v16 = vpop.f32.mrb[34].mxu1 }
0x1008   :  { %v2018_v60 = vpack.c.bf16 %v3406_v16, %v3405_v15  ;;  %v2005_v17 = vpop.f32.mrb[35].mxu1 }
0x1009   :  { %v2017_v18 = vpack.c.bf16 %v2005_v17, %v2002_v59 }
0x100b   :  { %3423 = vmatprep.mubr.bf16.mxu0 %v2017_v18 }
0x100c   :  { %3424 = vmatmul.mubr.bf16.vlgmr.msra.gmra.mrb[36].mxu0 %v2018_v60  ;;  %v2898_v60 = vld [vmem:[%s4839_s12 + $0x1] ss:$0 sm:$0xff] }
0x10df   :  { %v3425_v12 = vpop.f32.mrb[36].mxu0 }
0x10e0   :  { %v2126_v13 = vpop.f32.mrb[37].mxu0  ;;  %v2135_v27 = vadd.f32 %v3425_v12, %v2887_v19 }
0x10e1   :  { %v2127_v20 = vadd.f32 %v2887_v19, %v2126_v13  ;;  %v3426_v21 = vpop.f32.mrb[38].mxu0 }
0x10e2   :  { %v2129_v24 = vpop.f32.mrb[39].mxu0  ;;  %v2138_v56 = vadd.f32 %v3426_v21, %v2887_v19  ;;  %v4647_v33 = vadd.f32 %v2135_v27, %v4438_v39  ;;  %v3644_v39 = vld [vmem:[%s4841_s14 + $0x94] ss:$8 sps:$4 sm:$0xff]  }
0x10e3   :  { %v4640_v28 = vadd.f32 %v2127_v20, %v4430_v25  ;;  %v2130_v43 = vadd.f32 %v2887_v19, %v2129_v24  ;;  %v3639_v25 = vld [vmem:[%s4841_s14 + $0x80] ss:$8 sps:$4 sm:$0xff]  }
0x10e4   :  { %v4651_v54 = vadd.f32 %v2138_v56, %v4442_v34  ;;  %v3642_v34 = vld [vmem:[%s4841_s14 + $0x90] ss:$8 sps:$4 sm:$0xff]   ;;  %v2899_v20 = vld [vmem:[%s4840_s13 + $0x1] ss:$0 sm:$0xff] }
0x10e5   :  { %v4643_v32 = vadd.f32 %v2130_v43, %v4434_v22  ;;  %2149 = vadd.xlane.f32.xlu0 %v4640_v28  ;;  %v3641_v22 = vld [vmem:[%s4841_s14 + $0x84] ss:$8 sps:$4 sm:$0xff]  }
0x10e6   :  { %2325 = vmatprep.subr.bf16.mxu1 %v3641_v22 }
0x10e7   :  { %2151 = vadd.xlane.f32.xlu1 %v4643_v32  ;;  %2326 = vmatpush1.bf16.msra.mxu1 %v3639_v25 }
0x10e8   :  { %2327 = vmatprep.subr.bf16.mxu1 %v3644_v39 }
0x10e9   :  { %2153 = vadd.xlane.f32.xlu0 %v4647_v33 }
0x10eb   :  { %2155 = vadd.xlane.f32.xlu1 %v4651_v54  ;;  %2328 = vmatpush1.bf16.msra.mxu1 %v3642_v34 }
0x10ec   :  { %2329 = vmatprep.subr.bf16.mxu1 %v3647_v58  ;;  %v3677_v58 = vld [vmem:[%s4843_s16 + $0xf8] sm:$0xff]  }
0x10ef   :  { %2330 = vmatpush1.bf16.msra.mxu1 %v3645_v61  ;;  %v3678_v61 = vld [vmem:[%s4843_s16 + $0xb8] sm:$0xff]  }
0x10f0   :  { %2331 = vmatprep.subr.bf16.mxu1 %v3650_v0  ;;  %v2916_v0 = vld [vmem:[%s4842_s15 + $0x2] sm:$0x3] }
0x10f3   :  { %2332 = vmatpush1.bf16.msra.mxu1 %v3648_v3  ;;  %v2238_v3 = vrot.slane %v2916_v0, %v4170_v7 }
0x10f4   :  { %2333 = vmatprep.subr.bf16.mxu1 %v3653_v40  ;;  %v2242_v40 = vrot.slane %v2916_v0, %v4176_v9 }
0x10f7   :  { %2334 = vmatpush1.bf16.msra.mxu1 %v3651_v42 }
0x10f8   :  { %2335 = vmatprep.subr.bf16.mxu1 %v3656_v11 }
0x10fb   :  { %2336 = vmatpush1.bf16.msra.mxu1 %v3654_v5 }
0x10fc   :  { %2337 = vmatprep.subr.bf16.mxu1 %v3659_v47 }
0x10ff   :  { %2338 = vmatpush1.bf16.msra.mxu1 %v3657_v57 }
0x1100   :  { %2339 = vmatprep.subr.bf16.mxu1 %v3662_v51 }
0x1103   :  { %2340 = vmatpush1.bf16.msra.mxu1 %v3660_v62 }
0x1172   :  { %v2150_v63 = vpop.xlane.xlu0 %2149 }
0x1173   :  { %v2157_v36 = vmul.f32 0.0078125, %v2150_v63 }
0x1174   :  { %v2152_v30 = vpop.xlane.xlu1 %2151 }
0x1175   :  { %v2161_v29 = vsub.f32 %v4640_v28, %v2157_v36  ;;  %v2158_v41 = vmul.f32 0.0078125, %v2152_v30 }
0x1176   :  { %v2154_v44 = vpop.xlane.xlu0 %2153 }
0x1177   :  { %v2162_v45 = vsub.f32 %v4643_v32, %v2158_v41  ;;  %v2159_v46 = vmul.f32 0.0078125, %v2154_v44  ;;  %v2165_v48 = vmul.f32 %v2161_v29, %v2161_v29  ;;  %v3664_v41 = vld [vmem:[%s4843_s16 + $0x80] sm:$0xff]   ;;  %v3666_v44 = vld [vmem:[%s4843_s16 + $0x88] sm:$0xff]  }
0x1178   :  { %v2156_v50 = vpop.xlane.xlu1 %2155 }
0x1179   :  { %v2163_v37 = vsub.f32 %v4647_v33, %v2159_v46  ;;  %v2160_v53 = vmul.f32 0.0078125, %v2156_v50  ;;  %2169 = vadd.xlane.f32.xlu0 %v2165_v48  ;;  %v2166_v38 = vmul.f32 %v2162_v45, %v2162_v45  ;;  %v3668_v46 = vld [vmem:[%s4843_s16 + $0x90] sm:$0xff]   ;;  %v3669_v48 = vld [vmem:[%s4843_s16 + $0xd8] sm:$0xff]  }
0x117a   :  { %v3670_v50 = vld [vmem:[%s4843_s16 + $0x98] sm:$0xff]  }
0x117b   :  { %v2164_v49 = vsub.f32 %v4651_v54, %v2160_v53  ;;  %2171 = vadd.xlane.f32.xlu1 %v2166_v38  ;;  %v2167_v52 = vmul.f32 %v2163_v37, %v2163_v37  ;;  %v3672_v53 = vld [vmem:[%s4843_s16 + $0xa0] sm:$0xff]   ;;  %v3673_v38 = vld [vmem:[%s4843_s16 + $0xe8] sm:$0xff]  }
0x117d   :  { %2173 = vadd.xlane.f32.xlu0 %v2167_v52  ;;  %v2168_v55 = vmul.f32 %v2164_v49, %v2164_v49  ;;  %v3675_v52 = vld [vmem:[%s4843_s16 + $0xf0] sm:$0xff]  }
0x117f   :  { %2175 = vadd.xlane.f32.xlu1 %v2168_v55  ;;  %v3676_v55 = vld [vmem:[%s4843_s16 + $0xb0] sm:$0xff]  }
0x1206   :  { %v2170_v1 = vpop.xlane.xlu0 %2169 }
0x1207   :  { %v2177_v2 = vmul.f32 0.0078125, %v2170_v1 }
0x1208   :  { %v2172_v4 = vpop.xlane.xlu1 %2171 }
0x1209   :  { %v2181_v8 = vadd.f32 1e-06, %v2177_v2  ;;  %v2178_v23 = vmul.f32 0.0078125, %v2172_v4 }
0x120a   :  { %v2174_v31 = vpop.xlane.xlu0 %2173 }
0x120b   :  { %3751 = vrsqrt.f32 %v2181_v8  ;;  %v2182_v26 = vadd.f32 1e-06, %v2178_v23  ;;  %v2179_v14 = vmul.f32 0.0078125, %v2174_v31 }
0x120c   :  { %v2176_v10 = vpop.xlane.xlu1 %2175 }
0x120d   :  { %3753 = vrsqrt.f32 %v2182_v26  ;;  %v2183_v35 = vadd.f32 1e-06, %v2179_v14  ;;  %v2180_v15 = vmul.f32 0.0078125, %v2176_v10 }
0x120f   :  { %3755 = vrsqrt.f32 %v2183_v35  ;;  %v2184_v59 = vadd.f32 1e-06, %v2180_v15 }
0x1211   :  { %3757 = vrsqrt.f32 %v2184_v59 }
0x1215   :  { %v3752_v16 = vpop.eup %3751 }
0x1216   :  { %v2189_v17 = vmul.f32 %v3752_v16, %v2161_v29  ;;  %v3663_v29 = vld [vmem:[%s4843_s16 + $0xc0] sm:$0xff]  }
0x1217   :  { %v3754_v18 = vpop.eup %3753  ;;  %3143 = vmatprep.subr.bf16.mxu0 %v3663_v29  ;;  %3491 = vmatprep.subr.bf16.mxu1 %v3663_v29 }
0x1218   :  { %v2190_v19 = vmul.f32 %v3754_v18, %v2162_v45  ;;  %v2199_v12 = vmul.f32 %v2898_v60, %v2189_v17  ;;  %3144 = vmatpush3.bf16.msra.mxu0 %v3664_v41  ;;  %v3667_v45 = vld [vmem:[%s4843_s16 + $0xd0] sm:$0xff]  }
0x1219   :  { %v3756_v13 = vpop.eup %3755 }
0x121a   :  { %v2200_v21 = vmul.f32 %v2898_v60, %v2190_v19  ;;  %v2209_v27 = vadd.f32 %v2899_v20, %v2199_v12  ;;  %v2191_v56 = vmul.f32 %v3756_v13, %v2163_v37  ;;  %v3671_v37 = vld [vmem:[%s4843_s16 + $0xe0] sm:$0xff]  }
0x121b   :  { %v3758_v24 = vpop.eup %3757 }
0x121c   :  { %v2210_v43 = vadd.f32 %v2899_v20, %v2200_v21  ;;  %v2192_v25 = vmul.f32 %v3758_v24, %v2164_v49  ;;  %v2201_v34 = vmul.f32 %v2898_v60, %v2191_v56  ;;  %v3674_v49 = vld [vmem:[%s4843_s16 + $0xa8] sm:$0xff]  }
0x121e   :  { %v2213_v22 = vpack.c.bf16 %v2210_v43, %v2209_v27  ;;  %v2202_v39 = vmul.f32 %v2898_v60, %v2192_v25  ;;  %v2211_v36 = vadd.f32 %v2899_v20, %v2201_v34 }
0x1220   :  { %2358 = vmatmul.mubr.bf16.vlgmr.msra.gmra.mrb[36].mxu1 %v2213_v22  ;;  %v2212_v63 = vadd.f32 %v2899_v20, %v2202_v39 }
0x1221   :  { %2367 = vmatprep.mubr.bf16.mxu1 %v3811_v6  ;;  %3499 = vmatpush3.bf16.msra.mxu1 %v3664_v41  ;;  %v3665_v6 = vld [vmem:[%s4843_s16 + $0xc8] sm:$0xff]  }
0x1222   :  { %v2214_v30 = vpack.c.bf16 %v2212_v63, %v2211_v36  ;;  %3145 = vmatprep.subr.bf16.mxu0 %v3665_v6  ;;  %3492 = vmatprep.subr.bf16.mxu1 %v3665_v6 }
0x1223   :  { %3146 = vmatpush3.bf16.msra.mxu0 %v3666_v44 }
0x1224   :  { %3147 = vmatprep.subr.bf16.mxu0 %v3667_v45 }
0x1225   :  { %3500 = vmatpush3.bf16.msra.mxu1 %v3666_v44 }
0x1226   :  { %3493 = vmatprep.subr.bf16.mxu1 %v3667_v45 }
0x1227   :  { %3148 = vmatpush3.bf16.msra.mxu0 %v3668_v46 }
0x1228   :  { %2368 = vmatmul.mubr.bf16.gmra.mrb[40].mxu1 %v2214_v30  ;;  %3149 = vmatprep.subr.bf16.mxu0 %v3669_v48 }
0x1229   :  { %3501 = vmatpush3.bf16.msra.mxu1 %v3668_v46 }
0x122a   :  { %3494 = vmatprep.subr.bf16.mxu1 %v3669_v48 }
0x122b   :  { %3150 = vmatpush3.bf16.msra.mxu0 %v3670_v50 }
0x122c   :  { %3151 = vmatprep.subr.bf16.mxu0 %v3671_v37 }
0x122d   :  { %3502 = vmatpush3.bf16.msra.mxu1 %v3670_v50 }
0x122e   :  { %3495 = vmatprep.subr.bf16.mxu1 %v3671_v37 }
0x122f   :  { %3152 = vmatpush3.bf16.msra.mxu0 %v3672_v53 }
0x1230   :  { %3153 = vmatprep.subr.bf16.mxu0 %v3673_v38 }
0x1231   :  { %3503 = vmatpush3.bf16.msra.mxu1 %v3672_v53 }
0x1232   :  { %3496 = vmatprep.subr.bf16.mxu1 %v3673_v38 }
0x1233   :  { %3154 = vmatpush3.bf16.msra.mxu0 %v3674_v49 }
0x1234   :  { %3155 = vmatprep.subr.bf16.mxu0 %v3675_v52 }
0x1235   :  { %3504 = vmatpush3.bf16.msra.mxu1 %v3674_v49 }
0x1236   :  { %3497 = vmatprep.subr.bf16.mxu1 %v3675_v52 }
0x1237   :  { %3156 = vmatpush3.bf16.msra.mxu0 %v3676_v55 }
0x1238   :  { %3157 = vmatprep.subr.bf16.mxu0 %v3677_v58 }
0x1239   :  { %3505 = vmatpush3.bf16.msra.mxu1 %v3676_v55 }
0x123a   :  { %3498 = vmatprep.subr.bf16.mxu1 %v3677_v58 }
0x123b   :  { %3158 = vmatpush3.bf16.msra.mxu0 %v3678_v61 }
0x123d   :  { %3506 = vmatpush3.bf16.msra.mxu1 %v3678_v61 }
0x12f3   :  { %v2359_v42 = vpop.f32.mrb[36].mxu1 }
0x12f4   :  { %v4767_v5 = vadd.f32 %v2359_v42, %v2238_v3  ;;  %v2361_v11 = vpop.f32.mrb[37].mxu1 }
0x12f5   :  { %v4769_v47 = vadd.f32 %v2361_v11, %v2242_v40  ;;  %v2363_v57 = vpop.f32.mrb[38].mxu1 }
0x12f6   :  { %v2386_v51 = vmul.f32 0.044715, %v4767_v5  ;;  %v2364_v62 = vadd.f32 %v2363_v57, %v2238_v3  ;;  %v2365_v1 = vpop.f32.mrb[39].mxu1  ;;  %v2378_v42 = vmul.f32 0.5, %v4767_v5 }
0x12f7   :  { %v2387_v2 = vmul.f32 0.044715, %v4769_v47  ;;  %v4773_v4 = vadd.f32 %v2365_v1, %v2242_v40  ;;  %v2379_v1 = vmul.f32 0.5, %v4769_v47 }
0x12f8   :  { %v2394_v8 = vmul.f32 %v2386_v51, %v4767_v5  ;;  %v2388_v7 = vmul.f32 0.044715, %v2364_v62  ;;  %v2380_v11 = vmul.f32 0.5, %v2364_v62 }
0x12f9   :  { %v2395_v9 = vmul.f32 %v2387_v2, %v4769_v47  ;;  %v2389_v23 = vmul.f32 0.044715, %v4773_v4 }
0x12fa   :  { %v2402_v31 = vmul.f32 %v2394_v8, %v4767_v5  ;;  %v2396_v26 = vmul.f32 %v2388_v7, %v2364_v62  ;;  %v2381_v8 = vmul.f32 0.5, %v4773_v4 }
0x12fb   :  { %v2403_v14 = vmul.f32 %v2395_v9, %v4769_v47  ;;  %v2397_v10 = vmul.f32 %v2389_v23, %v4773_v4  ;;  %v2369_v35 = vpop.f32.mrb[40].mxu1 }
0x12fc   :  { %v2410_v15 = vadd.f32 %v2402_v31, %v4767_v5  ;;  %v2404_v59 = vmul.f32 %v2396_v26, %v2364_v62  ;;  %v4782_v16 = vadd.f32 %v2369_v35, %v2238_v3  ;;  %v2371_v60 = vpop.f32.mrb[41].mxu1 }
0x12fd   :  { %v2405_v17 = vmul.f32 %v2397_v10, %v4773_v4  ;;  %v4785_v18 = vadd.f32 %v2371_v60, %v2242_v40  ;;  %v2373_v19 = vpop.f32.mrb[42].mxu1  ;;  %v2411_v12 = vadd.f32 %v2403_v14, %v4769_v47 }
0x12fe   :  { %v2418_v13 = vmul.f32 0.7978846, %v2410_v15  ;;  %v2412_v20 = vadd.f32 %v2404_v59, %v2364_v62  ;;  %v2390_v21 = vmul.f32 0.044715, %v4782_v16  ;;  %v2375_v24 = vpop.f32.mrb[43].mxu1  ;;  %v2374_v43 = vadd.f32 %v2373_v19, %v2238_v3 }
0x12ff   :  { %v2391_v27 = vmul.f32 0.044715, %v4785_v18  ;;  %v2376_v56 = vadd.f32 %v2375_v24, %v2242_v40  ;;  %v2413_v25 = vadd.f32 %v2405_v17, %v4773_v4  ;;  %v2419_v34 = vmul.f32 0.7978846, %v2411_v12 }
0x1300   :  { %3759 = vtanh.f32 %v2418_v13  ;;  %v2420_v22 = vmul.f32 0.7978846, %v2412_v20  ;;  %v2398_v39 = vmul.f32 %v2390_v21, %v4782_v16  ;;  %v2392_v36 = vmul.f32 0.044715, %v2374_v43 }
0x1301   :  { %v2399_v63 = vmul.f32 %v2391_v27, %v4785_v18  ;;  %v2393_v30 = vmul.f32 0.044715, %v2376_v56  ;;  %v2421_v41 = vmul.f32 0.7978846, %v2413_v25  ;;  %v2382_v17 = vmul.f32 0.5, %v4782_v16 }
0x1302   :  { %3761 = vtanh.f32 %v2420_v22  ;;  %v2406_v29 = vmul.f32 %v2398_v39, %v4782_v16  ;;  %v2400_v44 = vmul.f32 %v2392_v36, %v2374_v43  ;;  %v2384_v47 = vmul.f32 0.5, %v2374_v43 }
0x1303   :  { %v2407_v6 = vmul.f32 %v2399_v63, %v4785_v18  ;;  %v2401_v45 = vmul.f32 %v2393_v30, %v2376_v56  ;;  %3763 = vtanh.f32 %v2419_v34  ;;  %v2383_v4 = vmul.f32 0.5, %v4785_v18 }
0x1304   :  { %v2414_v46 = vadd.f32 %v2406_v29, %v4782_v16  ;;  %3765 = vtanh.f32 %v2421_v41  ;;  %v2408_v48 = vmul.f32 %v2400_v44, %v2374_v43  ;;  %v2385_v12 = vmul.f32 0.5, %v2376_v56  ;;  %v2966_v16 = vld [vmem:[%s4844_s17 + $0x1] ss:$0 sm:$0xff] }
0x1305   :  { %v2409_v50 = vmul.f32 %v2401_v45, %v2376_v56  ;;  %v2415_v37 = vadd.f32 %v2407_v6, %v4785_v18 }
0x1306   :  { %v2422_v53 = vmul.f32 0.7978846, %v2414_v46  ;;  %v2416_v38 = vadd.f32 %v2408_v48, %v2374_v43 }
0x1307   :  { %v2417_v49 = vadd.f32 %v2409_v50, %v2376_v56  ;;  %v2423_v52 = vmul.f32 0.7978846, %v2415_v37 }
0x1308   :  { %3767 = vtanh.f32 %v2422_v53  ;;  %v2424_v55 = vmul.f32 0.7978846, %v2416_v38 }
0x1309   :  { %v2425_v58 = vmul.f32 0.7978846, %v2417_v49  ;;  %3769 = vtanh.f32 %v2423_v52 }
0x130a   :  { %v3760_v61 = vpop.eup %3759  ;;  %3771 = vtanh.f32 %v2424_v55 }
0x130b   :  { %v2434_v0 = vadd.f32 1.0, %v3760_v61  ;;  %3773 = vtanh.f32 %v2425_v58 }
0x130c   :  { %v3762_v3 = vpop.eup %3761 }
0x130d   :  { %v3764_v40 = vpop.eup %3763  ;;  %v2436_v57 = vadd.f32 1.0, %v3762_v3  ;;  %v2442_v9 = vmul.f32 %v2434_v0, %v2378_v42 }
0x130e   :  { %v3766_v51 = vpop.eup %3765  ;;  %v2435_v2 = vadd.f32 1.0, %v3764_v40 }
0x130f   :  { %v2437_v7 = vadd.f32 1.0, %v3766_v51  ;;  %v2444_v23 = vmul.f32 %v2436_v57, %v2380_v11 }
0x1310   :  { %v2443_v31 = vmul.f32 %v2435_v2, %v2379_v1 }
0x1311   :  { %v2445_v26 = vmul.f32 %v2437_v7, %v2381_v8  ;;  %v2450_v14 = vpack.c.bf16 %v2444_v23, %v2442_v9 }
0x1312   :  { %v3768_v10 = vpop.eup %3767 }
0x1313   :  { %v3770_v35 = vpop.eup %3769  ;;  %v2451_v15 = vpack.c.bf16 %v2445_v26, %v2443_v31  ;;  %v2438_v59 = vadd.f32 1.0, %v3768_v10 }
0x1314   :  { %v3772_v60 = vpop.eup %3771  ;;  %v2439_v5 = vadd.f32 1.0, %v3770_v35 }
0x1315   :  { %2623 = vmatprep.mubr.bf16.mxu0 %v2451_v15  ;;  %v3774_v62 = vpop.eup %3773  ;;  %v2440_v19 = vadd.f32 1.0, %v3772_v60  ;;  %v2446_v20 = vmul.f32 %v2438_v59, %v2382_v17 }
0x1316   :  { %2624 = vmatmul.mubr.bf16.vlgmr.msra.gmra.mrb[40].mxu0 %v2450_v14  ;;  %v2441_v13 = vadd.f32 1.0, %v3774_v62  ;;  %v2447_v24 = vmul.f32 %v2439_v5, %v2383_v4  ;;  %v2983_v5 = vld [vmem:[%s4845_s18] ss:$0 sm:$0xff]  ;;  %s3812_s18 = smov [#allocation2]  }
0x1317   :  { %v2448_v21 = vmul.f32 %v2440_v19, %v2384_v47  ;;  %v2984_v47 = vld [vmem:[%s4846_s19] ss:$0 sm:$0xff]  ;;  %s2719_s11 = sshll.u32 %s3812_s18, 4  ;;  %s2720_s11 = int_to_ptr.vmem [resolvable:$true] %s2719_s11 }
0x1318   :  { %v2449_v27 = vmul.f32 %v2441_v13, %v2385_v12  ;;  %s3787_s19 = scalar_lea.vmem %s2720_s11, 512  ;;  %p3792_p1 = scmp.lt.s32.totalorder %s2720_s11, %s2720_s11 }
0x1319   :  { %v2452_v25 = vpack.c.bf16 %v2448_v21, %v2446_v20  ;;  %p3788_p0 = scmp.ne.s32.totalorder %s2720_s11, %s3787_s19  ;;  %p3793_p2 = scmp.lt.s32.totalorder %s3787_s19, %s3787_s19 }
0x131a   :  { %v2453_v22 = vpack.c.bf16 %v2449_v27, %v2447_v24 }
0x131b   :  { %p3794_p3 = por %p3793_p2, %p3792_p1 }
0x131c   :  { %2631 = vmatprep.mubr.bf16.mxu1 %v2453_v22 }
0x131d   :  { %2632 = vmatmul.mubr.bf16.vlgmr.msra.gmra.mrb[44].mxu1 %v2452_v25  ;;  %p3795_p4 = pnand %p3794_p3, %p3788_p0 }
0x13e9   :  { %v3159_v39 = vpop.f32.mrb[40].mxu0 }
0x13ea   :  { %v3160_v43 = vpop.f32.mrb[41].mxu0 }
0x13eb   :  { %v3161_v34 = vadd.f32 %v3160_v43, %v3159_v39  ;;  %v3162_v63 = vpop.f32.mrb[42].mxu0 }
0x13ec   :  { %v3163_v36 = vpop.f32.mrb[43].mxu0 }
0x13ed   :  { %v2626_v18 = vadd.f32 %v3161_v34, %v2966_v16  ;;  %v3164_v56 = vadd.f32 %v3163_v36, %v3162_v63 }
0x13ef   :  { %v2629_v30 = vadd.f32 %v3164_v56, %v2966_v16  ;;  %v2640_v29 = vadd.f32 %v2626_v18, %v4640_v28 }
0x13f0   :  { %v3165_v41 = vpop.f32.mrb[44].mxu1 }
0x13f1   :  { %2646 = vadd.xlane.f32.xlu0 %v2640_v29  ;;  %v2641_v6 = vadd.f32 %v2629_v30, %v4643_v32  ;;  %v3166_v44 = vpop.f32.mrb[45].mxu1 }
0x13f2   :  { %v3167_v45 = vadd.f32 %v3166_v44, %v3165_v41  ;;  %v3168_v46 = vpop.f32.mrb[46].mxu1 }
0x13f3   :  { %2648 = vadd.xlane.f32.xlu1 %v2641_v6  ;;  %v3169_v48 = vpop.f32.mrb[47].mxu1 }
0x13f4   :  { %v2634_v50 = vadd.f32 %v3167_v45, %v2966_v16  ;;  %v3170_v37 = vadd.f32 %v3169_v48, %v3168_v46 }
0x13f6   :  { %v2637_v53 = vadd.f32 %v3170_v37, %v2966_v16  ;;  %v2642_v38 = vadd.f32 %v2634_v50, %v4647_v33 }
0x13f8   :  { %2650 = vadd.xlane.f32.xlu0 %v2642_v38  ;;  %v2643_v49 = vadd.f32 %v2637_v53, %v4651_v54 }
0x13fa   :  { %2652 = vadd.xlane.f32.xlu1 %v2643_v49 }
0x147e   :  { %v2647_v52 = vpop.xlane.xlu0 %2646 }
0x147f   :  { %v2654_v28 = vmul.f32 0.0078125, %v2647_v52 }
0x1480   :  { %v2649_v55 = vpop.xlane.xlu1 %2648 }
0x1481   :  { %v2658_v58 = vsub.f32 %v2640_v29, %v2654_v28  ;;  %v2655_v61 = vmul.f32 0.0078125, %v2649_v55 }
0x1483   :  { %v2659_v32 = vsub.f32 %v2641_v6, %v2655_v61  ;;  %v2662_v0 = vmul.f32 %v2658_v58, %v2658_v58 }
0x1485   :  { %2666 = vadd.xlane.f32.xlu0 %v2662_v0  ;;  %v2663_v3 = vmul.f32 %v2659_v32, %v2659_v32  ;;  %v2651_v40 = vpop.xlane.xlu0 %2650 }
0x1486   :  { %v2656_v42 = vmul.f32 0.0078125, %v2651_v40 }
0x1487   :  { %2668 = vadd.xlane.f32.xlu1 %v2663_v3  ;;  %v2653_v11 = vpop.xlane.xlu1 %2652 }
0x1488   :  { %v2660_v57 = vsub.f32 %v2642_v38, %v2656_v42  ;;  %v2657_v51 = vmul.f32 0.0078125, %v2653_v11 }
0x148a   :  { %v2661_v33 = vsub.f32 %v2643_v49, %v2657_v51  ;;  %v2664_v1 = vmul.f32 %v2660_v57, %v2660_v57 }
0x148c   :  { %2670 = vadd.xlane.f32.xlu0 %v2664_v1  ;;  %v2665_v54 = vmul.f32 %v2661_v33, %v2661_v33 }
0x148e   :  { %2672 = vadd.xlane.f32.xlu1 %v2665_v54 }
0x1512   :  { %v2667_v2 = vpop.xlane.xlu0 %2666 }
0x1513   :  { %v2674_v8 = vmul.f32 0.0078125, %v2667_v2 }
0x1514   :  { %v2669_v7 = vpop.xlane.xlu1 %2668 }
0x1515   :  { %v2678_v9 = vadd.f32 1e-06, %v2674_v8  ;;  %v2675_v23 = vmul.f32 0.0078125, %v2669_v7 }
0x1517   :  { %3775 = vrsqrt.f32 %v2678_v9  ;;  %v2679_v31 = vadd.f32 1e-06, %v2675_v23 }
0x1519   :  { %3777 = vrsqrt.f32 %v2679_v31  ;;  %v2671_v26 = vpop.xlane.xlu0 %2670 }
0x151a   :  { %v2676_v14 = vmul.f32 0.0078125, %v2671_v26 }
0x151b   :  { %v2673_v10 = vpop.xlane.xlu1 %2672 }
0x151c   :  { %v2680_v35 = vadd.f32 1e-06, %v2676_v14  ;;  %v2677_v15 = vmul.f32 0.0078125, %v2673_v10 }
0x151e   :  { %3779 = vrsqrt.f32 %v2680_v35  ;;  %v2681_v59 = vadd.f32 1e-06, %v2677_v15 }
0x1520   :  { %3781 = vrsqrt.f32 %v2681_v59 }
0x1521   :  { %v3776_v60 = vpop.eup %3775 }
0x1522   :  { %v2686_v62 = vmul.f32 %v3776_v60, %v2658_v58 }
0x1523   :  { %v3778_v17 = vpop.eup %3777 }
0x1524   :  { %v2696_v19 = vmul.f32 %v2983_v5, %v2686_v62  ;;  %v2687_v4 = vmul.f32 %v3778_v17, %v2659_v32 }
0x1526   :  { %v2697_v12 = vmul.f32 %v2983_v5, %v2687_v4  ;;  %v2706_v13 = vadd.f32 %v2984_v47, %v2696_v19 }
0x1528   :  { %v2707_v20 = vadd.f32 %v2984_v47, %v2697_v12  ;;  %2710 = vst [vmem:[#allocation2] sm:$0xff] %v2706_v13  ;;  %v3780_v21 = vpop.eup %3779 }
0x1529   :  { %v2688_v24 = vmul.f32 %v3780_v21, %v2660_v57 }
0x152a   :  { %2711 = vst [vmem:[#allocation2 + $0x8] sm:$0xff] %v2707_v20  ;;  %v3782_v27 = vpop.eup %3781 }
0x152b   :  { %v2698_v25 = vmul.f32 %v2983_v5, %v2688_v24  ;;  %v2689_v22 = vmul.f32 %v3782_v27, %v2661_v33 }
0x152d   :  { %v2708_v39 = vadd.f32 %v2984_v47, %v2698_v25  ;;  %v2699_v16 = vmul.f32 %v2983_v5, %v2689_v22 }
0x152f   :  { %2712 = vst [vmem:[#allocation2 + $0x10] sm:$0xff] %v2708_v39  ;;  %v2709_v43 = vadd.f32 %v2984_v47, %v2699_v16 }
0x1531   :  { %2713 = vst [vmem:[#allocation2 + $0x18] sm:$0xff] %v2709_v43 }
0x1532   :  { %3798 = shalt.err (!%p3795_p4)
}
0x1533   :  { %s3799_s3 = scalar_lea.hbm %s4847_s20, 512 }
0x1534   :  { %p3800_p5 = scmp.ne.s32.totalorder %s4847_s20, %s3799_s3  ;;  %p3803_p6 = scmp.lt.u32.totalorder %s3799_s3, %s4847_s20 }
0x1536   :  { %p3805_p7 = pnand %p3803_p6, %p3800_p5 }
0x1538   :  { %3808 = shalt.err (!%p3805_p7)
}
0x1539   :  { %s3813_s23 = smov 128   ;;  %s3814_s14 = smov 8  }
0x153a   :  { %2725 = dma.vmem_to_hbm [thread:$0]  %s2720_s11, 512, %s4847_s20, [#allocation3], %s3813_s23, %s3813_s23, %s3814_s14  }
0x153b   :  { %3809 = dma.done.wait [#allocation3], 512  }
0x153c   :  { %3810 = vsyncadd [#allocation3], 4294966784 }
0x153d   :  { %2729 = vsyncpa [#allocation3], 1 }

</bundles_post_ra>
